<compile_context>
chip_gen: v6e
topology: v6e:2x2x1
jax: 0.10.0
libtpu: 0.0.40
codegen_flags: <defaults>
</compile_context>

<pallas_src>
import functools

import jax
import jax.numpy as jnp
from jax import lax
from jax.experimental import pallas as pl
from jax.experimental.pallas import tpu as pltpu


D_MODEL = 512
NUM_HEADS = 8
D_K = D_MODEL // NUM_HEADS


def _vmem_limit_bytes():
    """Generation-aware scoped-VMEM budget (v7x: 64 MiB, v5e/v6e: 128 MiB)."""
    cap = 64 * 1024 * 1024
    try:
        info = pltpu.get_tpu_info()
        cap = int(getattr(info, "vmem_capacity_bytes", cap)) or cap
    except Exception:
        pass
    return min(96 * 1024 * 1024, (3 * cap) // 4)


VMEM_LIMIT = _vmem_limit_bytes()


# ----------------------------------------------------------------------------
# Linear projection kernel:  out = x @ W + b  (bf16 MXU operands, f32 accum)
# Used for the fused QKV projection ([D,3D] weight) and the output projection.
# ----------------------------------------------------------------------------
def linear_kernel(x_ref, w_ref, b_ref, o_ref):
    x = x_ref[...].astype(jnp.bfloat16)          # no-op when x is already bf16
    acc = jnp.dot(x, w_ref[...], preferred_element_type=jnp.float32)
    o_ref[...] = (acc + b_ref[...]).astype(o_ref.dtype)


def _pick_tile_m(M, d_in, d_out, in_bytes, out_bytes, budget):
    """Largest M-tile whose double-buffered x/out tiles fit the budget, preferring
    a tile that divides M so no jnp.pad copy of the activation is needed."""
    per_row = 2 * (d_in * in_bytes + d_out * out_bytes)
    max_tm = min(4096, max(8, int(budget // per_row)))
    if M <= max_tm:
        return M, 0                                   # single full block
    tm = (max_tm // 8) * 8
    while tm >= 8:
        if M % tm == 0:
            return tm, 0
        tm -= 8
    tm = (max_tm // 8) * 8                            # TODO(synk): ragged last block
    return tm, (-M) % tm


def linear(x2d, w_bf16, b_f32, *, out_dtype=jnp.bfloat16):
    """x2d: [M, D_in] (any float dtype), w_bf16: [D_in, D_out] bf16,
    b_f32: [1, D_out] f32 -> [M, D_out] out_dtype."""
    M, d_in = x2d.shape
    d_out = w_bf16.shape[1]
    budget = max(4 << 20, VMEM_LIMIT - 2 * d_in * d_out * 2 - (2 << 20))
    tm, pad = _pick_tile_m(M, d_in, d_out, x2d.dtype.itemsize,
                           jnp.dtype(out_dtype).itemsize, int(budget * 0.7))
    x_p = jnp.pad(x2d, ((0, pad), (0, 0))) if pad else x2d
    grid_m = (M + pad) // tm

    out = pl.pallas_call(
        linear_kernel,
        grid=(grid_m,),
        out_shape=jax.ShapeDtypeStruct((grid_m * tm, d_out), out_dtype),
        in_specs=[
            pl.BlockSpec((tm, d_in), lambda i: (i, 0)),
            pl.BlockSpec((d_in, d_out), lambda i: (0, 0)),   # weight stays resident
            pl.BlockSpec((1, d_out), lambda i: (0, 0)),
        ],
        out_specs=pl.BlockSpec((tm, d_out), lambda i: (i, 0)),
        compiler_params=pltpu.CompilerParams(
            dimension_semantics=("parallel",),
            vmem_limit_bytes=VMEM_LIMIT,
        ),
    )(x_p, w_bf16, b_f32)
    return out[:M] if pad else out


# ----------------------------------------------------------------------------
# Attention kernel: a block of heads per grid step, heads read as dk-wide lane
# chunks of a [B, S, n_heads*dk] (or fused [B, S, 3*H*dk]) activation.
#   scores_h = (q_h/sqrt(dk)) @ k_h^T ; masked_fill(mask==0,-1e9) ; softmax(f32)
#   ctx_h    = softmax @ v_h   -> written back in [B, S, D] layout (no transpose)
# ----------------------------------------------------------------------------
def attn_kernel(*refs, heads, dk, scale, has_mask, with_weights):
    q_ref, k_ref, v_ref = refs[0], refs[1], refs[2]
    nin = 4 if has_mask else 3
    mask_ref = refs[3] if has_mask else None
    out_refs = refs[nin:]
    if with_weights:
        w_ref, ctx_ref = out_refs
    else:
        (ctx_ref,) = out_refs

    mask = mask_ref[0] if has_mask else None          # (S, S) bf16

    ctx_parts = []
    for h in range(heads):                            # unrolled over heads in block
        lo, hi = h * dk, (h + 1) * dk
        # Scale folded into q (exact for dk=64 since 1/8 is a power of two).
        qh = q_ref[0, :, lo:hi] * scale               # (S, dk) bf16
        kh = k_ref[0, :, lo:hi]
        vh = v_ref[0, :, lo:hi]

        s = lax.dot_general(qh, kh, (((1,), (1,)), ((), ())),
                            preferred_element_type=jnp.float32)       # (S, S)
        if has_mask:
            s = jnp.where(mask == 0, jnp.float32(-1e9), s)

        # Numerically stable softmax, f32 elementwise math (v5e-friendly).
        m = jnp.max(s, axis=-1, keepdims=True)
        e = jnp.exp(s - m)
        p = e * pl.reciprocal(jnp.sum(e, axis=-1, keepdims=True))     # exact

        if with_weights:
            w_ref[0, h] = p.astype(w_ref.dtype)

        ctx_parts.append(
            lax.dot_general(p.astype(jnp.bfloat16), vh, (((1,), (0,)), ((), ())),
                            preferred_element_type=jnp.float32))

    # One lane-dense (S, heads*dk) store; HBM block is >=128 lanes wide.
    ctx_ref[0] = jnp.concatenate(ctx_parts, axis=-1).astype(ctx_ref.dtype)


def _pick_heads_per_block(B, H, S, dk, *, with_weights, weights_bytes, has_mask,
                          budget_bytes):
    """Largest valid head block fitting VMEM; keeps >=2 parallel grid steps."""
    valid = [c for c in range(1, H + 1) if H % c == 0 and (c * dk) % 128 == 0]
    if not valid:
        raise ValueError("need a head-block whose lane width is a multiple of 128")
    fixed = 2 * S * S * 2 if has_mask else 0                 # bf16 mask, double-buffered

    def cost(c):
        io = 2 * (3 * S * c * dk * 2 + S * c * dk * 2)       # q,k,v in + ctx out (bf16, x2)
        w_out = 2 * c * S * S * weights_bytes if with_weights else 0
        tmp = 3 * c * S * S * 4                              # live f32 softmax temporaries
        return fixed + io + w_out + tmp

    fitting = [c for c in valid if cost(c) <= budget_bytes]
    hpb = max(fitting) if fitting else min(valid)
    while B * (H // hpb) < 2:                                # v7x: feed both TensorCores
        smaller = [c for c in valid if c < hpb]
        if not smaller:
            break
        hpb = max(smaller)
    return hpb


def attention(q_arr, k_arr, v_arr, mask=None, *, num_heads, d_k,
              head_offsets=(0, 0, 0), heads_per_block=None,
              return_weights=True, weights_dtype=jnp.float32):
    """q/k/v_arr: [B,S,*] bf16 with heads as dk-wide lane chunks starting at
    head_offsets (all three may alias the same fused [B,S,3*H*dk] array).
    mask: optional [B,S,S] (0 => masked).
    Returns (attn_weights [B,H,S,S] or None, ctx [B,S,H*dk] bf16)."""
    B, S, _ = q_arr.shape
    H, dk = num_heads, d_k
    has_mask = mask is not None

    hpb = heads_per_block or _pick_heads_per_block(
        B, H, S, dk, with_weights=return_weights,
        weights_bytes=jnp.dtype(weights_dtype).itemsize, has_mask=has_mask,
        budget_bytes=int(VMEM_LIMIT * 0.7))
    scale = 1.0 / (dk ** 0.5)
    q_off, k_off, v_off = (off // hpb for off in head_offsets)

    kernel = functools.partial(attn_kernel, heads=hpb, dk=dk, scale=scale,
                               has_mask=has_mask, with_weights=return_weights)

    blk_w = hpb * dk

    def head_spec(off):
        return pl.BlockSpec((1, S, blk_w), lambda b, h, o=off: (b, 0, o + h))

    in_specs = [head_spec(q_off), head_spec(k_off), head_spec(v_off)]
    args = [q_arr, k_arr, v_arr]
    if has_mask:
        in_specs.append(pl.BlockSpec((1, S, S), lambda b, h: (b, 0, 0)))
        args.append(mask.astype(jnp.bfloat16))

    ctx_sds = jax.ShapeDtypeStruct((B, S, H * dk), jnp.bfloat16)
    ctx_spec = pl.BlockSpec((1, S, blk_w), lambda b, h: (b, 0, h))
    if return_weights:
        out_shape = (jax.ShapeDtypeStruct((B, H, S, S), weights_dtype), ctx_sds)
        out_specs = (pl.BlockSpec((1, hpb, S, S), lambda b, h: (b, h, 0, 0)), ctx_spec)
    else:
        out_shape = ctx_sds
        out_specs = ctx_spec

    outs = pl.pallas_call(
        kernel,
        grid=(B, H // hpb),
        in_specs=in_specs,
        out_specs=out_specs,
        out_shape=out_shape,
        compiler_params=pltpu.CompilerParams(
            dimension_semantics=("parallel", "parallel"),
            vmem_limit_bytes=VMEM_LIMIT,
        ),
    )(*args)

    if return_weights:
        return outs[0], outs[1]
    return None, outs


# ----------------------------------------------------------------------------
# Parameter preprocessing (hoisted out of the forward path): bf16 weights and
# the concatenated [D, 3D] QKV weight / [1, 3D] bias are built once.
# ----------------------------------------------------------------------------
def preprocess_params(params):
    wq = params["wq"].astype(jnp.bfloat16)
    wk = params["wk"].astype(jnp.bfloat16)
    wv = params["wv"].astype(jnp.bfloat16)
    wo = params["wo"].astype(jnp.bfloat16)
    return {
        "w_qkv": jnp.concatenate([wq, wk, wv], axis=1),                       # [D, 3D] bf16
        "b_qkv": jnp.concatenate([params["bq"], params["bk"], params["bv"]],  # [1, 3D] f32
                                 axis=1),
        "wq": wq, "bq": params["bq"],
        "wk": wk, "bk": params["bk"],
        "wv": wv, "bv": params["bv"],
        "wo": wo, "bo": params["bo"],
    }


# ----------------------------------------------------------------------------
# Full MultiHeadAttention forward
# ----------------------------------------------------------------------------
def multi_head_attention(pparams, Q, K, V, mask=None, *, heads_per_block=None,
                         return_weights=True, weights_dtype=jnp.float32,
                         fuse_qkv=None):
    """Q,K,V: [B,S,d_model]; mask: optional [B,S,S] (0 => masked).
    Returns (output [B,S,d_model] in Q.dtype, attn_weights [B,H,S,S] or None)."""
    B, S, D = Q.shape
    H, dk = NUM_HEADS, D_K
    out_dtype = Q.dtype

    if fuse_qkv is None:
        fuse_qkv = (Q is K) and (K is V)      # pass fuse_qkv=True for equal-but-distinct arrays

    if fuse_qkv:
        # One matmul per M-tile against the resident [D, 3D] weight; attention
        # reads q/k/v as lane offsets of the fused result (no XLA split/transpose).
        qkv = linear(Q.reshape(B * S, D), pparams["w_qkv"],
                     pparams["b_qkv"]).reshape(B, S, 3 * D)
        attn_w, ctx = attention(qkv, qkv, qkv, mask, num_heads=H, d_k=dk,
                                head_offsets=(0, H, 2 * H),
                                heads_per_block=heads_per_block,
                                return_weights=return_weights,
                                weights_dtype=weights_dtype)
    else:
        q2 = linear(Q.reshape(B * S, D), pparams["wq"], pparams["bq"]).reshape(B, S, D)
        k2 = linear(K.reshape(B * S, D), pparams["wk"], pparams["bk"]).reshape(B, S, D)
        v2 = linear(V.reshape(B * S, D), pparams["wv"], pparams["bv"]).reshape(B, S, D)
        attn_w, ctx = attention(q2, k2, v2, mask, num_heads=H, d_k=dk,
                                heads_per_block=heads_per_block,
                                return_weights=return_weights,
                                weights_dtype=weights_dtype)

    # ctx is already in [B, S, H*dk] layout (head transpose folded into the kernel).
    out = linear(ctx.reshape(B * S, D), pparams["wo"], pparams["bo"],
                 out_dtype=out_dtype).reshape(B, S, D)
    return out, attn_w


# ----------------------------------------------------------------------------
# Pure-JAX reference (mirrors the PyTorch forward). mm_dtype mimics the kernel's
# bf16-operand / f32-accumulate matmuls for a tight comparison.
# ----------------------------------------------------------------------------
def reference_mha(params, Q, K, V, mask=None, mm_dtype=jnp.float32):
    B, S, D = Q.shape
    H, dk = NUM_HEADS, D_K

    def mm(a, b):
        return jnp.matmul(a.astype(mm_dtype), b.astype(mm_dtype),
                          preferred_element_type=jnp.float32)

    def proj(x, w, bias):
        y = mm(x.reshape(B * S, D), w) + bias
        return y.reshape(B, S, H, dk).transpose(0, 2, 1, 3)

    q = proj(Q, params["wq"], params["bq"])
    k = proj(K, params["wk"], params["bk"])
    v = proj(V, params["wv"], params["bv"])
    scores = jnp.einsum("bhqd,bhkd->bhqk", q.astype(mm_dtype), k.astype(mm_dtype),
                        preferred_element_type=jnp.float32) / jnp.sqrt(jnp.float32(dk))
    if mask is not None:
        scores = jnp.where(mask[:, None, :, :] == 0, -1e9, scores)
    w = jax.nn.softmax(scores, axis=-1)
    ctx = jnp.einsum("bhqk,bhkd->bhqd", w.astype(mm_dtype), v.astype(mm_dtype),
                     preferred_element_type=jnp.float32)
    ctx = ctx.transpose(0, 2, 1, 3).reshape(B * S, D)
    out = mm(ctx, params["wo"]) + params["bo"]
    return out.reshape(B, S, D), w


def init_params(key):
    # nn.Linear-shaped params stored as [in, out] so kernels compute x @ W; bias (1, D).
    keys = jax.random.split(key, 8)
    bound = 1.0 / (D_MODEL ** 0.5)

    def mk_w(k):
        return jax.random.uniform(k, (D_MODEL, D_MODEL), jnp.float32, -bound, bound)

    def mk_b(k):
        return jax.random.uniform(k, (1, D_MODEL), jnp.float32, -bound, bound)

    return {
        "wq": mk_w(keys[0]), "bq": mk_b(keys[1]),
        "wk": mk_w(keys[2]), "bk": mk_b(keys[3]),
        "wv": mk_w(keys[4]), "bv": mk_b(keys[5]),
        "wo": mk_w(keys[6]), "bo": mk_b(keys[7]),
    }


if __name__ == "__main__":
    key = jax.random.PRNGKey(0)
    kp, k1, k2, k3, k4 = jax.random.split(key, 5)

    B, S = 2, 8
    params = init_params(kp)
    pparams = preprocess_params(params)      # bf16 cast + QKV concat hoisted out of forward

    # ---- self-attention (fused QKV projection) with a causal mask ------------
    X = jax.random.normal(k1, (B, S, D_MODEL), jnp.float32)
    mask = jnp.tril(jnp.ones((S, S), jnp.float32))[None].repeat(B, axis=0)

    out, attn_w = multi_head_attention(pparams, X, X, X, mask)
    jax.block_until_ready((out, attn_w))
    assert out.shape == (B, S, D_MODEL)
    assert attn_w.shape == (B, NUM_HEADS, S, S)

    ref_out_bf, ref_w_bf = reference_mha(params, X, X, X, mask, mm_dtype=jnp.bfloat16)
    assert jnp.allclose(attn_w, ref_w_bf, atol=2e-2, rtol=2e-2)
    assert jnp.allclose(out, ref_out_bf, atol=2e-2, rtol=2e-2)

    ref_out_f32, _ = reference_mha(params, X, X, X, mask, mm_dtype=jnp.float32)
    assert jnp.allclose(out, ref_out_f32, atol=6e-2, rtol=6e-2)

    # ---- cross-attention (separate projections), no mask ---------------------
    Q = jax.random.normal(k2, (B, S, D_MODEL), jnp.float32)
    K = jax.random.normal(k3, (B, S, D_MODEL), jnp.float32)
    V = jax.random.normal(k4, (B, S, D_MODEL), jnp.float32)

    out2, attn_w2 = multi_head_attention(pparams, Q, K, V, mask=None)
    jax.block_until_ready((out2, attn_w2))
    ref_out2, ref_w2 = reference_mha(params, Q, K, V, None, mm_dtype=jnp.bfloat16)
    assert jnp.allclose(attn_w2, ref_w2, atol=2e-2, rtol=2e-2)
    assert jnp.allclose(out2, ref_out2, atol=2e-2, rtol=2e-2)

    # ---- optional: skip the S^2 attention-weight writeback -------------------
    out3, none_w = multi_head_attention(pparams, Q, K, V, mask=None, return_weights=False)
    jax.block_until_ready(out3)
    assert none_w is None
    assert jnp.allclose(out3, out2, atol=1e-5, rtol=1e-5)

    print("KERNEL_OK")
</pallas_src>

<mosaic_0001>
module attributes {stable_mosaic.version = 11 : i64} {
  func.func @linear_kernel(%arg0: i32, %arg1: memref<16x512xf32, #tpu.memory_space<vmem>>, %arg2: memref<512x1536xbf16, #tpu.memory_space<vmem>>, %arg3: memref<1x1536xf32, #tpu.memory_space<vmem>>, %arg4: memref<16x1536xbf16, #tpu.memory_space<vmem>>) attributes {dimension_semantics = [#tpu.dimension_semantics<parallel>], iteration_bounds = array<i64: 1>, scalar_prefetch = 0 : i64, scratch_operands = 0 : i64, tpu.core_type = #tpu.core_type<tc>, window_params = [{transform_indices = @transform_0, window_bounds = array<i64: 16, 512>}, {pipeline_mode = #tpu.pipeline_mode<synchronous>, transform_indices = @transform_1, window_bounds = array<i64: 512, 1536>}, {pipeline_mode = #tpu.pipeline_mode<synchronous>, transform_indices = @transform_2, window_bounds = array<i64: 1, 1536>}, {transform_indices = @transform_3, window_bounds = array<i64: 16, 1536>}]} {
    %c0 = arith.constant 0 : index
    %c0_0 = arith.constant 0 : index
    %0 = vector.load %arg1[%c0, %c0_0] : memref<16x512xf32, #tpu.memory_space<vmem>>, vector<16x512xf32>
    %1 = arith.truncf %0 : vector<16x512xf32> to vector<16x512xbf16>
    %c0_1 = arith.constant 0 : index
    %c0_2 = arith.constant 0 : index
    %2 = vector.load %arg2[%c0_1, %c0_2] : memref<512x1536xbf16, #tpu.memory_space<vmem>>, vector<512x1536xbf16>
    %cst = arith.constant dense<0.000000e+00> : vector<16x1536xf32>
    %3 = tpu.matmul %1, %2, %cst {dimension_numbers = #tpu.dot_dimension_numbers<[1], [0], [0], [1], [0, 0, 1, 1], [], []>} : vector<16x512xbf16>, vector<512x1536xbf16>, vector<16x1536xf32> -> vector<16x1536xf32>
    %c0_3 = arith.constant 0 : index
    %c0_4 = arith.constant 0 : index
    %4 = vector.load %arg3[%c0_3, %c0_4] : memref<1x1536xf32, #tpu.memory_space<vmem>>, vector<1x1536xf32>
    %5 = vector.broadcast %4 : vector<1x1536xf32> to vector<16x1536xf32>
    %6 = arith.addf %3, %5 : vector<16x1536xf32>
    %7 = arith.truncf %6 : vector<16x1536xf32> to vector<16x1536xbf16>
    %c0_5 = arith.constant 0 : index
    %c0_6 = arith.constant 0 : index
    %8 = vector.load %arg4[%c0_5, %c0_6] : memref<16x1536xbf16, #tpu.memory_space<vmem>>, vector<16x1536xbf16>
    tpu.vector_store %arg4[%c0_5, %c0_6], %7 {strides = array<i32>} : memref<16x1536xbf16, #tpu.memory_space<vmem>>, vector<16x1536xbf16>,
    return
  }
  func.func @transform_0(%arg0: i32) -> (i32, i32) {
    %c0_i32 = arith.constant 0 : i32
    %c0_i32_0 = arith.constant 0 : i32
    return %arg0, %c0_i32 : i32, i32
  }
  func.func @transform_1(%arg0: i32) -> (i32, i32) {
    %c0_i32 = arith.constant 0 : i32
    %c0_i32_0 = arith.constant 0 : i32
    %c0_i32_1 = arith.constant 0 : i32
    return %c0_i32, %c0_i32_0 : i32, i32
  }
  func.func @transform_2(%arg0: i32) -> (i32, i32) {
    %c0_i32 = arith.constant 0 : i32
    %c0_i32_0 = arith.constant 0 : i32
    %c0_i32_1 = arith.constant 0 : i32
    return %c0_i32, %c0_i32_0 : i32, i32
  }
  func.func @transform_3(%arg0: i32) -> (i32, i32) {
    %c0_i32 = arith.constant 0 : i32
    %c0_i32_0 = arith.constant 0 : i32
    return %arg0, %c0_i32 : i32, i32
  }
}

</mosaic_0001>

<bundles_post_ra>
// kernel: tpu_custom_call.1
= control target key start
LH: loop header
LB: loop body
LE: loop exit
PB: predicated region body
PF: predicated region fallthrough
CT: control target
= control target key end

     0   :  { %8 = vsyncpa [#allocation3], 0  ;;  %s4244_s0 = inlined_call_operand.hbm [shape: f32[16,512], index: 0, kind: input, shape index: {}]   ;;  %s4245_s1 = inlined_call_operand.hbm [shape: bf16[512,1536], index: 1, kind: input, shape index: {}]   ;;  %s4246_s2 = inlined_call_operand.hbm [shape: f32[1,1536], index: 2, kind: input, shape index: {}]   ;;  %s4247_s3 = inlined_call_operand.hbm [shape: bf16[16,1536], index: 3, kind: output, shape index: {}]  }
   0x1   :  { %9 = vsyncpa [#allocation6], 0 }
   0x2   :  { %10 = vsyncpa [#allocation4], 0  ;;  %s4130_s12 = smov [#allocation5]  }
   0x3   :  { %s28_s13 = sshll.u32 %s4130_s12, 4  ;;  %s29_s13 = int_to_ptr.vmem [resolvable:$true] %s28_s13 }
   0x4   :  { %s4052_s14 = scalar_lea.vmem %s29_s13, 49152  ;;  %p4057_p1 = scmp.lt.s32.totalorder %s29_s13, %s29_s13 }
   0x5   :  { %p4053_p0 = scmp.ne.s32.totalorder %s29_s13, %s4052_s14  ;;  %p4058_p2 = scmp.lt.s32.totalorder %s4052_s14, %s4052_s14 }
   0x7   :  { %p4059_p3 = por %p4058_p2, %p4057_p1 }
   0x9   :  { %p4060_p4 = pnand %p4059_p3, %p4053_p0 }
   0xb   :  { %4063 = shalt.err (!%p4060_p4)
}
   0xc   :  { %s4131_s15 = smov 768   ;;  %s4132_s16 = smov 48  }
   0xd   :  { %34 = dma.hbm_to_vmem [thread:$0]  %s4245_s1, 49152, %s29_s13, [#allocation6], %s4131_s15, %s4131_s15, %s4132_s16  }
   0xe   :  { %s4133_s19 = smov [#allocation2]  }
   0xf   :  { %s16_s20 = sshll.u32 %s4133_s19, 4  ;;  %s17_s20 = int_to_ptr.vmem [resolvable:$true] %s16_s20 }
  0x10   :  { %s4072_s21 = scalar_lea.vmem %s17_s20, 1024  ;;  %p4077_p6 = scmp.lt.s32.totalorder %s17_s20, %s17_s20 }
  0x11   :  { %p4073_p5 = scmp.ne.s32.totalorder %s17_s20, %s4072_s21  ;;  %p4078_p7 = scmp.lt.s32.totalorder %s4072_s21, %s4072_s21 }
  0x13   :  { %p4079_p8 = por %p4078_p7, %p4077_p6 }
  0x15   :  { %p4080_p9 = pnand %p4079_p8, %p4073_p5 }
  0x17   :  { %4083 = shalt.err (!%p4080_p9)
}
  0x18   :  { %s4134_s22 = smov 512   ;;  %s4135_s23 = smov 32  }
  0x19   :  { %22 = dma.hbm_to_vmem [thread:$0]  %s4244_s0, 1024, %s17_s20, [#allocation3], %s4134_s22, %s4134_s22, %s4135_s23  }
  0x1a   :  { %s4136_s26 = smov [#allocation7]  }
  0x1b   :  { %s41_s27 = sshll.u32 %s4136_s26, 4  ;;  %s42_s27 = int_to_ptr.vmem [resolvable:$true] %s41_s27 }
  0x1c   :  { %s4092_s1 = scalar_lea.vmem %s42_s27, 192  ;;  %p4097_p11 = scmp.lt.s32.totalorder %s42_s27, %s42_s27 }
  0x1d   :  { %p4093_p10 = scmp.ne.s32.totalorder %s42_s27, %s4092_s1  ;;  %p4098_p12 = scmp.lt.s32.totalorder %s4092_s1, %s4092_s1 }
  0x1f   :  { %p4099_p13 = por %p4098_p12, %p4097_p11 }
  0x21   :  { %p4100_p0 = pnand %p4099_p13, %p4093_p10 }
  0x23   :  { %4103 = shalt.err (!%p4100_p0)
}
  0x24   :  { %44 = dma.hbm_to_vmem [thread:$0]  %s4246_s2, 192, %s42_s27, [#allocation6]  }
  0x25   :  { %4124 = dma.done.wait [#allocation3], 1024  }
  0x26   :  { %4125 = vsyncadd [#allocation3], 4294966272 }
  0x27   :  { %4126 = dma.done.wait [#allocation6], 49344  }
  0x28   :  { %4127 = vsyncadd [#allocation6], 4294917952  ;;  %v3468_v0 = vld [vmem:[#allocation5 + $0x2a4] ss:$48 sps:$4 sm:$0xff]   ;;  %v3472_v2 = vld [vmem:[#allocation5 + $0x2a0] ss:$48 sps:$4 sm:$0xff]  }
  0x29   :  { %v3470_v1 = vld [vmem:[#allocation5 + $0x8a4] ss:$48 sps:$4 sm:$0xff]   ;;  %2434 = vmatprep.subr.bf16.mxu0 %v3468_v0  ;;  %v3473_v3 = vld [vmem:[#allocation5 + $0x8a0] ss:$48 sps:$4 sm:$0xff]   ;;  %v55_v46 = vld [vmem:[#allocation2 + $0x8] sm:$0xff]  ;;  %s4137_s0 = smov [#allocation8]  }
  0x2a   :  { %2477 = vmatprep.subr.bf16.mxu1 %v3470_v1  ;;  %v3474_v4 = vld [vmem:[#allocation5 + $0x244] ss:$48 sps:$4 sm:$0xff]   ;;  %2435 = vmatpush1.bf16.msra.mxu0 %v3472_v2  ;;  %v3478_v6 = vld [vmem:[#allocation5 + $0x240] ss:$48 sps:$4 sm:$0xff]   ;;  %v59_v47 = vld [vmem:[#allocation2 + $0x28] sm:$0xff]  ;;  %s3039_s2 = sshll.u32 %s4137_s0, 4  ;;  %s3040_s2 = int_to_ptr.vmem [resolvable:$true] %s3039_s2 }
  0x2b   :  { %2478 = vmatpush1.bf16.msra.mxu1 %v3473_v3  ;;  %v3476_v5 = vld [vmem:[#allocation5 + $0x844] ss:$48 sps:$4 sm:$0xff]   ;;  %2436 = vmatprep.subr.bf16.mxu0 %v3474_v4  ;;  %v3479_v7 = vld [vmem:[#allocation5 + $0x840] ss:$48 sps:$4 sm:$0xff]   ;;  %v57_v48 = vld [vmem:[#allocation2 + $0x18] sm:$0xff]  ;;  %v4170_v53 = vpack.c.bf16 %v59_v47, %v55_v46  ;;  %s4104_s30 = scalar_lea.vmem %s3040_s2, 1536  ;;  %p4109_p2 = scmp.lt.s32.totalorder %s3040_s2, %s3040_s2 }
  0x2c   :  { %2479 = vmatprep.subr.bf16.mxu1 %v3476_v5  ;;  %v3480_v8 = vld [vmem:[#allocation5 + $0x1e4] ss:$48 sps:$4 sm:$0xff]   ;;  %v3484_v10 = vld [vmem:[#allocation5 + $0x1e0] ss:$48 sps:$4 sm:$0xff]   ;;  %v61_v49 = vld [vmem:[#allocation2 + $0x38] sm:$0xff]  ;;  %p4105_p1 = scmp.ne.s32.totalorder %s3040_s2, %s4104_s30  ;;  %p4110_p3 = scmp.lt.s32.totalorder %s4104_s30, %s4104_s30 }
  0x2d   :  { %v3482_v9 = vld [vmem:[#allocation5 + $0x7e4] ss:$48 sps:$4 sm:$0xff]   ;;  %v3485_v11 = vld [vmem:[#allocation5 + $0x7e0] ss:$48 sps:$4 sm:$0xff]   ;;  %v4172_v54 = vpack.c.bf16 %v61_v49, %v57_v48  ;;  %2466 = vmatprep.mubr.bf16.mxu0 %v4170_v53  ;;  %v3612_v46 = vld [vmem:[#allocation5 + $0x5a8] ss:$48 sps:$4 sm:$0xff]  }
  0x2e   :  { %2437 = vmatpush1.bf16.msra.mxu0 %v3478_v6  ;;  %v3486_v12 = vld [vmem:[#allocation5 + $0x184] ss:$48 sps:$4 sm:$0xff]   ;;  %v3490_v14 = vld [vmem:[#allocation5 + $0x180] ss:$48 sps:$4 sm:$0xff]   ;;  %v3615_v47 = vld [vmem:[#allocation5 + $0xba8] ss:$48 sps:$4 sm:$0xff]   ;;  %p4111_p4 = por %p4110_p3, %p4109_p2 }
  0x2f   :  { %2480 = vmatpush1.bf16.msra.mxu1 %v3479_v7  ;;  %2438 = vmatprep.subr.bf16.mxu0 %v3480_v8  ;;  %v3488_v13 = vld [vmem:[#allocation5 + $0x784] ss:$48 sps:$4 sm:$0xff]   ;;  %v3491_v15 = vld [vmem:[#allocation5 + $0x780] ss:$48 sps:$4 sm:$0xff]   ;;  %v3620_v48 = vld [vmem:[#allocation5 + $0x54c] ss:$48 sps:$4 sm:$0xff]  }
  0x30   :  { %2481 = vmatprep.subr.bf16.mxu1 %v3482_v9  ;;  %v3492_v16 = vld [vmem:[#allocation5 + $0x124] ss:$48 sps:$4 sm:$0xff]   ;;  %v3496_v18 = vld [vmem:[#allocation5 + $0x120] ss:$48 sps:$4 sm:$0xff]   ;;  %2509 = vmatprep.mubr.bf16.mxu1 %v4172_v54  ;;  %v3623_v49 = vld [vmem:[#allocation5 + $0xb4c] ss:$48 sps:$4 sm:$0xff]   ;;  %p4112_p5 = pnand %p4111_p4, %p4105_p1 }
  0x31   :  { %v3494_v17 = vld [vmem:[#allocation5 + $0x724] ss:$48 sps:$4 sm:$0xff]   ;;  %v3497_v19 = vld [vmem:[#allocation5 + $0x720] ss:$48 sps:$4 sm:$0xff]  }
  0x32   :  { %2439 = vmatpush1.bf16.msra.mxu0 %v3484_v10  ;;  %v3498_v20 = vld [vmem:[#allocation5 + $0xc4] ss:$48 sps:$4 sm:$0xff]   ;;  %v3502_v22 = vld [vmem:[#allocation5 + $0xc0] ss:$48 sps:$4 sm:$0xff]   ;;  %v3566_v10 = vld [vmem:[#allocation5 + $0x2ac] ss:$48 sps:$4 sm:$0xff]  }
  0x33   :  { %2482 = vmatpush1.bf16.msra.mxu1 %v3485_v11  ;;  %2440 = vmatprep.subr.bf16.mxu0 %v3486_v12  ;;  %v3500_v21 = vld [vmem:[#allocation5 + $0x6c4] ss:$48 sps:$4 sm:$0xff]   ;;  %v3503_v23 = vld [vmem:[#allocation5 + $0x6c0] ss:$48 sps:$4 sm:$0xff]   ;;  %v3569_v11 = vld [vmem:[#allocation5 + $0x8ac] ss:$48 sps:$4 sm:$0xff]  }
  0x34   :  { %2483 = vmatprep.subr.bf16.mxu1 %v3488_v13  ;;  %v3504_v24 = vld [vmem:[#allocation5 + $0x64] ss:$48 sps:$4 sm:$0xff]   ;;  %v3508_v26 = vld [vmem:[#allocation5 + $0x60] ss:$48 sps:$4 sm:$0xff]  }
  0x35   :  { %v3506_v25 = vld [vmem:[#allocation5 + $0x664] ss:$48 sps:$4 sm:$0xff]   ;;  %v3509_v27 = vld [vmem:[#allocation5 + $0x660] ss:$48 sps:$4 sm:$0xff]  }
  0x36   :  { %2441 = vmatpush1.bf16.msra.mxu0 %v3490_v14  ;;  %v3510_v28 = vld [vmem:[#allocation5 + $0x4] ss:$48 sps:$4 sm:$0xff]   ;;  %v3514_v30 = vld [vmem:[#allocation5] ss:$48 sps:$4 sm:$0xff]   ;;  %v3564_v14 = vld [vmem:[#allocation5 + $0x2a8] ss:$48 sps:$4 sm:$0xff]  }
  0x37   :  { %2484 = vmatpush1.bf16.msra.mxu1 %v3491_v15  ;;  %2442 = vmatprep.subr.bf16.mxu0 %v3492_v16  ;;  %v3512_v29 = vld [vmem:[#allocation5 + $0x604] ss:$48 sps:$4 sm:$0xff]   ;;  %v3515_v31 = vld [vmem:[#allocation5 + $0x600] ss:$48 sps:$4 sm:$0xff]   ;;  %v3567_v15 = vld [vmem:[#allocation5 + $0x8a8] ss:$48 sps:$4 sm:$0xff]  }
  0x38   :  { %2485 = vmatprep.subr.bf16.mxu1 %v3494_v17  ;;  %v3516_v32 = vld [vmem:[#allocation5 + $0x5a4] ss:$48 sps:$4 sm:$0xff]   ;;  %v3520_v34 = vld [vmem:[#allocation5 + $0x5a0] ss:$48 sps:$4 sm:$0xff]   ;;  %v3572_v16 = vld [vmem:[#allocation5 + $0x24c] ss:$48 sps:$4 sm:$0xff]  }
  0x39   :  { %v3518_v33 = vld [vmem:[#allocation5 + $0xba4] ss:$48 sps:$4 sm:$0xff]   ;;  %v3521_v35 = vld [vmem:[#allocation5 + $0xba0] ss:$48 sps:$4 sm:$0xff]   ;;  %v3575_v17 = vld [vmem:[#allocation5 + $0x84c] ss:$48 sps:$4 sm:$0xff]  }
  0x3a   :  { %2443 = vmatpush1.bf16.msra.mxu0 %v3496_v18  ;;  %v3522_v36 = vld [vmem:[#allocation5 + $0x544] ss:$48 sps:$4 sm:$0xff]   ;;  %v3526_v38 = vld [vmem:[#allocation5 + $0x540] ss:$48 sps:$4 sm:$0xff]   ;;  %v3570_v18 = vld [vmem:[#allocation5 + $0x248] ss:$48 sps:$4 sm:$0xff]  }
  0x3b   :  { %2486 = vmatpush1.bf16.msra.mxu1 %v3497_v19  ;;  %2444 = vmatprep.subr.bf16.mxu0 %v3498_v20  ;;  %v3524_v37 = vld [vmem:[#allocation5 + $0xb44] ss:$48 sps:$4 sm:$0xff]   ;;  %v3527_v39 = vld [vmem:[#allocation5 + $0xb40] ss:$48 sps:$4 sm:$0xff]   ;;  %v3573_v19 = vld [vmem:[#allocation5 + $0x848] ss:$48 sps:$4 sm:$0xff]  }
  0x3c   :  { %2487 = vmatprep.subr.bf16.mxu1 %v3500_v21  ;;  %v3528_v40 = vld [vmem:[#allocation5 + $0x4e4] ss:$48 sps:$4 sm:$0xff]   ;;  %v3532_v42 = vld [vmem:[#allocation5 + $0x4e0] ss:$48 sps:$4 sm:$0xff]   ;;  %v3578_v20 = vld [vmem:[#allocation5 + $0x1ec] ss:$48 sps:$4 sm:$0xff]  }
  0x3d   :  { %v3530_v41 = vld [vmem:[#allocation5 + $0xae4] ss:$48 sps:$4 sm:$0xff]   ;;  %v3533_v43 = vld [vmem:[#allocation5 + $0xae0] ss:$48 sps:$4 sm:$0xff]   ;;  %v3581_v21 = vld [vmem:[#allocation5 + $0x7ec] ss:$48 sps:$4 sm:$0xff]  }
  0x3e   :  { %2445 = vmatpush1.bf16.msra.mxu0 %v3502_v22  ;;  %v3534_v44 = vld [vmem:[#allocation5 + $0x484] ss:$48 sps:$4 sm:$0xff]   ;;  %v3538_v50 = vld [vmem:[#allocation5 + $0x480] ss:$48 sps:$4 sm:$0xff]   ;;  %v3576_v22 = vld [vmem:[#allocation5 + $0x1e8] ss:$48 sps:$4 sm:$0xff]  }
  0x3f   :  { %2488 = vmatpush1.bf16.msra.mxu1 %v3503_v23  ;;  %2446 = vmatprep.subr.bf16.mxu0 %v3504_v24  ;;  %v3536_v45 = vld [vmem:[#allocation5 + $0xa84] ss:$48 sps:$4 sm:$0xff]   ;;  %v3539_v51 = vld [vmem:[#allocation5 + $0xa80] ss:$48 sps:$4 sm:$0xff]   ;;  %v3579_v23 = vld [vmem:[#allocation5 + $0x7e8] ss:$48 sps:$4 sm:$0xff]  }
  0x40   :  { %2489 = vmatprep.subr.bf16.mxu1 %v3506_v25  ;;  %v3540_v52 = vld [vmem:[#allocation5 + $0x424] ss:$48 sps:$4 sm:$0xff]   ;;  %v3544_v56 = vld [vmem:[#allocation5 + $0x420] ss:$48 sps:$4 sm:$0xff]   ;;  %v3584_v24 = vld [vmem:[#allocation5 + $0x18c] ss:$48 sps:$4 sm:$0xff]  }
  0x41   :  { %v3542_v55 = vld [vmem:[#allocation5 + $0xa24] ss:$48 sps:$4 sm:$0xff]   ;;  %v3545_v57 = vld [vmem:[#allocation5 + $0xa20] ss:$48 sps:$4 sm:$0xff]   ;;  %v3587_v25 = vld [vmem:[#allocation5 + $0x78c] ss:$48 sps:$4 sm:$0xff]  }
  0x42   :  { %2447 = vmatpush1.bf16.msra.mxu0 %v3508_v26  ;;  %v3546_v58 = vld [vmem:[#allocation5 + $0x3c4] ss:$48 sps:$4 sm:$0xff]   ;;  %v3550_v60 = vld [vmem:[#allocation5 + $0x3c0] ss:$48 sps:$4 sm:$0xff]   ;;  %v3582_v26 = vld [vmem:[#allocation5 + $0x188] ss:$48 sps:$4 sm:$0xff]  }
  0x43   :  { %2490 = vmatpush1.bf16.msra.mxu1 %v3509_v27  ;;  %2448 = vmatprep.subr.bf16.mxu0 %v3510_v28  ;;  %v3548_v59 = vld [vmem:[#allocation5 + $0x9c4] ss:$48 sps:$4 sm:$0xff]   ;;  %v3551_v61 = vld [vmem:[#allocation5 + $0x9c0] ss:$48 sps:$4 sm:$0xff]   ;;  %v3585_v27 = vld [vmem:[#allocation5 + $0x788] ss:$48 sps:$4 sm:$0xff]  }
  0x44   :  { %2491 = vmatprep.subr.bf16.mxu1 %v3512_v29  ;;  %v3552_v62 = vld [vmem:[#allocation5 + $0x364] ss:$48 sps:$4 sm:$0xff]   ;;  %v3556_v0 = vld [vmem:[#allocation5 + $0x360] ss:$48 sps:$4 sm:$0xff]   ;;  %v3590_v28 = vld [vmem:[#allocation5 + $0x12c] ss:$48 sps:$4 sm:$0xff]  }
  0x45   :  { %v3554_v63 = vld [vmem:[#allocation5 + $0x964] ss:$48 sps:$4 sm:$0xff]   ;;  %v3557_v1 = vld [vmem:[#allocation5 + $0x960] ss:$48 sps:$4 sm:$0xff]   ;;  %v3593_v29 = vld [vmem:[#allocation5 + $0x72c] ss:$48 sps:$4 sm:$0xff]  }
  0x46   :  { %2449 = vmatpush1.bf16.msra.mxu0 %v3514_v30  ;;  %v3558_v2 = vld [vmem:[#allocation5 + $0x304] ss:$48 sps:$4 sm:$0xff]   ;;  %v3562_v4 = vld [vmem:[#allocation5 + $0x300] ss:$48 sps:$4 sm:$0xff]   ;;  %v3588_v30 = vld [vmem:[#allocation5 + $0x128] ss:$48 sps:$4 sm:$0xff]  }
  0x47   :  { %2492 = vmatpush1.bf16.msra.mxu1 %v3515_v31  ;;  %2450 = vmatprep.subr.bf16.mxu0 %v3516_v32  ;;  %v3560_v3 = vld [vmem:[#allocation5 + $0x904] ss:$48 sps:$4 sm:$0xff]   ;;  %v3563_v5 = vld [vmem:[#allocation5 + $0x900] ss:$48 sps:$4 sm:$0xff]   ;;  %v3591_v31 = vld [vmem:[#allocation5 + $0x728] ss:$48 sps:$4 sm:$0xff]  }
  0x48   :  { %2493 = vmatprep.subr.bf16.mxu1 %v3518_v33  ;;  %v54_v6 = vld [vmem:[#allocation2] sm:$0xff]  ;;  %v56_v8 = vld [vmem:[#allocation2 + $0x10] sm:$0xff]  ;;  %v3596_v32 = vld [vmem:[#allocation5 + $0xcc] ss:$48 sps:$4 sm:$0xff]  }
  0x49   :  { %v58_v7 = vld [vmem:[#allocation2 + $0x20] sm:$0xff]  ;;  %v60_v9 = vld [vmem:[#allocation2 + $0x30] sm:$0xff]  ;;  %v3599_v33 = vld [vmem:[#allocation5 + $0x6cc] ss:$48 sps:$4 sm:$0xff]  }
  0x4a   :  { %2451 = vmatpush2.bf16.msra.mxu0 %v3520_v34  ;;  %v4176_v12 = vpack.c.bf16 %v58_v7, %v54_v6  ;;  %v4178_v13 = vpack.c.bf16 %v60_v9, %v56_v8  ;;  %v3594_v34 = vld [vmem:[#allocation5 + $0xc8] ss:$48 sps:$4 sm:$0xff]   ;;  %v3650_v6 = vld [vmem:[#allocation5 + $0x36c] ss:$48 sps:$4 sm:$0xff]  }
  0x4b   :  { %2494 = vmatpush2.bf16.msra.mxu1 %v3521_v35  ;;  %2452 = vmatprep.subr.bf16.mxu0 %v3522_v36  ;;  %v3597_v35 = vld [vmem:[#allocation5 + $0x6c8] ss:$48 sps:$4 sm:$0xff]   ;;  %v3602_v36 = vld [vmem:[#allocation5 + $0x6c] ss:$48 sps:$4 sm:$0xff]  }
  0x4c   :  { %2495 = vmatprep.subr.bf16.mxu1 %v3524_v37  ;;  %v3605_v37 = vld [vmem:[#allocation5 + $0x66c] ss:$48 sps:$4 sm:$0xff]   ;;  %v3648_v8 = vld [vmem:[#allocation5 + $0x368] ss:$48 sps:$4 sm:$0xff]  }
  0x4d   :  { %v3653_v7 = vld [vmem:[#allocation5 + $0x96c] ss:$48 sps:$4 sm:$0xff]   ;;  %v3651_v9 = vld [vmem:[#allocation5 + $0x968] ss:$48 sps:$4 sm:$0xff]  }
  0x4e   :  { %2453 = vmatpush2.bf16.msra.mxu0 %v3526_v38  ;;  %v3600_v38 = vld [vmem:[#allocation5 + $0x68] ss:$48 sps:$4 sm:$0xff]  }
  0x4f   :  { %2496 = vmatpush2.bf16.msra.mxu1 %v3527_v39  ;;  %2454 = vmatprep.subr.bf16.mxu0 %v3528_v40  ;;  %v3603_v39 = vld [vmem:[#allocation5 + $0x668] ss:$48 sps:$4 sm:$0xff]   ;;  %v3608_v40 = vld [vmem:[#allocation5 + $0xc] ss:$48 sps:$4 sm:$0xff]  }
  0x50   :  { %2497 = vmatprep.subr.bf16.mxu1 %v3530_v41  ;;  %v3611_v41 = vld [vmem:[#allocation5 + $0x60c] ss:$48 sps:$4 sm:$0xff]  }
  0x52   :  { %2455 = vmatpush2.bf16.msra.mxu0 %v3532_v42  ;;  %v3606_v42 = vld [vmem:[#allocation5 + $0x8] ss:$48 sps:$4 sm:$0xff]  }
  0x53   :  { %2498 = vmatpush2.bf16.msra.mxu1 %v3533_v43  ;;  %2456 = vmatprep.subr.bf16.mxu0 %v3534_v44  ;;  %v3609_v43 = vld [vmem:[#allocation5 + $0x608] ss:$48 sps:$4 sm:$0xff]   ;;  %v3614_v44 = vld [vmem:[#allocation5 + $0x5ac] ss:$48 sps:$4 sm:$0xff]  }
  0x54   :  { %2499 = vmatprep.subr.bf16.mxu1 %v3536_v45  ;;  %v3617_v45 = vld [vmem:[#allocation5 + $0xbac] ss:$48 sps:$4 sm:$0xff]  }
  0x56   :  { %2457 = vmatpush2.bf16.msra.mxu0 %v3538_v50  ;;  %v3618_v50 = vld [vmem:[#allocation5 + $0x548] ss:$48 sps:$4 sm:$0xff]  }
  0x57   :  { %2500 = vmatpush2.bf16.msra.mxu1 %v3539_v51  ;;  %2458 = vmatprep.subr.bf16.mxu0 %v3540_v52  ;;  %v3621_v51 = vld [vmem:[#allocation5 + $0xb48] ss:$48 sps:$4 sm:$0xff]   ;;  %v3626_v52 = vld [vmem:[#allocation5 + $0x4ec] ss:$48 sps:$4 sm:$0xff]  }
  0x58   :  { %2501 = vmatprep.subr.bf16.mxu1 %v3542_v55  ;;  %v3629_v55 = vld [vmem:[#allocation5 + $0xaec] ss:$48 sps:$4 sm:$0xff]  }
  0x5a   :  { %2459 = vmatpush2.bf16.msra.mxu0 %v3544_v56  ;;  %v3624_v56 = vld [vmem:[#allocation5 + $0x4e8] ss:$48 sps:$4 sm:$0xff]  }
  0x5b   :  { %2502 = vmatpush2.bf16.msra.mxu1 %v3545_v57  ;;  %2460 = vmatprep.subr.bf16.mxu0 %v3546_v58  ;;  %v3627_v57 = vld [vmem:[#allocation5 + $0xae8] ss:$48 sps:$4 sm:$0xff]   ;;  %v3632_v58 = vld [vmem:[#allocation5 + $0x48c] ss:$48 sps:$4 sm:$0xff]  }
  0x5c   :  { %2503 = vmatprep.subr.bf16.mxu1 %v3548_v59  ;;  %v3635_v59 = vld [vmem:[#allocation5 + $0xa8c] ss:$48 sps:$4 sm:$0xff]  }
  0x5e   :  { %2461 = vmatpush2.bf16.msra.mxu0 %v3550_v60  ;;  %v3630_v60 = vld [vmem:[#allocation5 + $0x488] ss:$48 sps:$4 sm:$0xff]  }
  0x5f   :  { %2504 = vmatpush2.bf16.msra.mxu1 %v3551_v61  ;;  %2462 = vmatprep.subr.bf16.mxu0 %v3552_v62  ;;  %v3633_v61 = vld [vmem:[#allocation5 + $0xa88] ss:$48 sps:$4 sm:$0xff]   ;;  %v3638_v62 = vld [vmem:[#allocation5 + $0x42c] ss:$48 sps:$4 sm:$0xff]  }
  0x60   :  { %2505 = vmatprep.subr.bf16.mxu1 %v3554_v63  ;;  %v3641_v63 = vld [vmem:[#allocation5 + $0xa2c] ss:$48 sps:$4 sm:$0xff]  }
  0x62   :  { %2463 = vmatpush2.bf16.msra.mxu0 %v3556_v0  ;;  %v3636_v0 = vld [vmem:[#allocation5 + $0x428] ss:$48 sps:$4 sm:$0xff]  }
  0x63   :  { %2506 = vmatpush2.bf16.msra.mxu1 %v3557_v1  ;;  %2464 = vmatprep.subr.bf16.mxu0 %v3558_v2  ;;  %v3639_v1 = vld [vmem:[#allocation5 + $0xa28] ss:$48 sps:$4 sm:$0xff]   ;;  %v3644_v2 = vld [vmem:[#allocation5 + $0x3cc] ss:$48 sps:$4 sm:$0xff]  }
  0x64   :  { %2507 = vmatprep.subr.bf16.mxu1 %v3560_v3  ;;  %v3647_v3 = vld [vmem:[#allocation5 + $0x9cc] ss:$48 sps:$4 sm:$0xff]  }
  0x66   :  { %2465 = vmatpush2.bf16.msra.mxu0 %v3562_v4  ;;  %v3642_v4 = vld [vmem:[#allocation5 + $0x3c8] ss:$48 sps:$4 sm:$0xff]  }
  0x67   :  { %2508 = vmatpush2.bf16.msra.mxu1 %v3563_v5  ;;  %2520 = vmatprep.subr.bf16.mxu0 %v3566_v10  ;;  %v3645_v5 = vld [vmem:[#allocation5 + $0x9c8] ss:$48 sps:$4 sm:$0xff]   ;;  %v3656_v10 = vld [vmem:[#allocation5 + $0x30c] ss:$48 sps:$4 sm:$0xff]  }
  0x68   :  { %2563 = vmatprep.subr.bf16.mxu1 %v3569_v11  ;;  %v3659_v11 = vld [vmem:[#allocation5 + $0x90c] ss:$48 sps:$4 sm:$0xff]  }
  0x69   :  { %2467 = vmatmul.mubr.bf16.vlgmr.msra.gmra.mxu0 %v4176_v12 }
  0x6a   :  { %2510 = vmatmul.mubr.bf16.vlgmr.msra.gmra.mxu1 %v4178_v13  ;;  %2521 = vmatpush1.bf16.msra.mxu0 %v3564_v14  ;;  %v3654_v14 = vld [vmem:[#allocation5 + $0x308] ss:$48 sps:$4 sm:$0xff]  }
  0x6b   :  { %2564 = vmatpush1.bf16.msra.mxu1 %v3567_v15  ;;  %2522 = vmatprep.subr.bf16.mxu0 %v3572_v16  ;;  %v3657_v15 = vld [vmem:[#allocation5 + $0x908] ss:$48 sps:$4 sm:$0xff]   ;;  %v3662_v16 = vld [vmem:[#allocation5 + $0x2b4] ss:$48 sps:$4 sm:$0xff]  }
  0x6c   :  { %2565 = vmatprep.subr.bf16.mxu1 %v3575_v17  ;;  %2552 = vmatprep.mubr.bf16.mxu0 %v4170_v53  ;;  %v3665_v17 = vld [vmem:[#allocation5 + $0x8b4] ss:$48 sps:$4 sm:$0xff]  }
  0x6d   :  { %2595 = vmatprep.mubr.bf16.mxu1 %v4172_v54 }
  0x6e   :  { %2523 = vmatpush1.bf16.msra.mxu0 %v3570_v18  ;;  %v3660_v18 = vld [vmem:[#allocation5 + $0x2b0] ss:$48 sps:$4 sm:$0xff]  }
  0x6f   :  { %2566 = vmatpush1.bf16.msra.mxu1 %v3573_v19  ;;  %2524 = vmatprep.subr.bf16.mxu0 %v3578_v20  ;;  %v3663_v19 = vld [vmem:[#allocation5 + $0x8b0] ss:$48 sps:$4 sm:$0xff]   ;;  %v3668_v20 = vld [vmem:[#allocation5 + $0x254] ss:$48 sps:$4 sm:$0xff]  }
  0x70   :  { %2567 = vmatprep.subr.bf16.mxu1 %v3581_v21  ;;  %v3671_v21 = vld [vmem:[#allocation5 + $0x854] ss:$48 sps:$4 sm:$0xff]  }
  0x72   :  { %2525 = vmatpush1.bf16.msra.mxu0 %v3576_v22  ;;  %v3666_v22 = vld [vmem:[#allocation5 + $0x250] ss:$48 sps:$4 sm:$0xff]  }
  0x73   :  { %2568 = vmatpush1.bf16.msra.mxu1 %v3579_v23  ;;  %2526 = vmatprep.subr.bf16.mxu0 %v3584_v24  ;;  %v3669_v23 = vld [vmem:[#allocation5 + $0x850] ss:$48 sps:$4 sm:$0xff]   ;;  %v3674_v24 = vld [vmem:[#allocation5 + $0x1f4] ss:$48 sps:$4 sm:$0xff]  }
  0x74   :  { %2569 = vmatprep.subr.bf16.mxu1 %v3587_v25  ;;  %v3677_v25 = vld [vmem:[#allocation5 + $0x7f4] ss:$48 sps:$4 sm:$0xff]  }
  0x76   :  { %2527 = vmatpush1.bf16.msra.mxu0 %v3582_v26  ;;  %v3672_v26 = vld [vmem:[#allocation5 + $0x1f0] ss:$48 sps:$4 sm:$0xff]  }
  0x77   :  { %2570 = vmatpush1.bf16.msra.mxu1 %v3585_v27  ;;  %2528 = vmatprep.subr.bf16.mxu0 %v3590_v28  ;;  %v3675_v27 = vld [vmem:[#allocation5 + $0x7f0] ss:$48 sps:$4 sm:$0xff]   ;;  %v3680_v28 = vld [vmem:[#allocation5 + $0x194] ss:$48 sps:$4 sm:$0xff]  }
  0x78   :  { %2571 = vmatprep.subr.bf16.mxu1 %v3593_v29  ;;  %v3683_v29 = vld [vmem:[#allocation5 + $0x794] ss:$48 sps:$4 sm:$0xff]  }
  0x7a   :  { %2529 = vmatpush1.bf16.msra.mxu0 %v3588_v30  ;;  %v3678_v30 = vld [vmem:[#allocation5 + $0x190] ss:$48 sps:$4 sm:$0xff]  }
  0x7b   :  { %2572 = vmatpush1.bf16.msra.mxu1 %v3591_v31  ;;  %2530 = vmatprep.subr.bf16.mxu0 %v3596_v32  ;;  %v3681_v31 = vld [vmem:[#allocation5 + $0x790] ss:$48 sps:$4 sm:$0xff]   ;;  %v3686_v32 = vld [vmem:[#allocation5 + $0x134] ss:$48 sps:$4 sm:$0xff]  }
  0x7c   :  { %2573 = vmatprep.subr.bf16.mxu1 %v3599_v33  ;;  %v3689_v33 = vld [vmem:[#allocation5 + $0x734] ss:$48 sps:$4 sm:$0xff]  }
  0x7e   :  { %2531 = vmatpush1.bf16.msra.mxu0 %v3594_v34  ;;  %v3684_v34 = vld [vmem:[#allocation5 + $0x130] ss:$48 sps:$4 sm:$0xff]  }
  0x7f   :  { %2574 = vmatpush1.bf16.msra.mxu1 %v3597_v35  ;;  %2532 = vmatprep.subr.bf16.mxu0 %v3602_v36  ;;  %v3687_v35 = vld [vmem:[#allocation5 + $0x730] ss:$48 sps:$4 sm:$0xff]   ;;  %v3692_v36 = vld [vmem:[#allocation5 + $0xd4] ss:$48 sps:$4 sm:$0xff]  }
  0x80   :  { %2575 = vmatprep.subr.bf16.mxu1 %v3605_v37  ;;  %v3695_v37 = vld [vmem:[#allocation5 + $0x6d4] ss:$48 sps:$4 sm:$0xff]  }
  0x82   :  { %2533 = vmatpush1.bf16.msra.mxu0 %v3600_v38  ;;  %v3690_v38 = vld [vmem:[#allocation5 + $0xd0] ss:$48 sps:$4 sm:$0xff]  }
  0x83   :  { %2576 = vmatpush1.bf16.msra.mxu1 %v3603_v39  ;;  %2534 = vmatprep.subr.bf16.mxu0 %v3608_v40  ;;  %v3693_v39 = vld [vmem:[#allocation5 + $0x6d0] ss:$48 sps:$4 sm:$0xff]   ;;  %v3698_v40 = vld [vmem:[#allocation5 + $0x74] ss:$48 sps:$4 sm:$0xff]  }
  0x84   :  { %2577 = vmatprep.subr.bf16.mxu1 %v3611_v41  ;;  %v3701_v41 = vld [vmem:[#allocation5 + $0x674] ss:$48 sps:$4 sm:$0xff]  }
  0x86   :  { %2535 = vmatpush1.bf16.msra.mxu0 %v3606_v42  ;;  %v3696_v42 = vld [vmem:[#allocation5 + $0x70] ss:$48 sps:$4 sm:$0xff]  }
  0x87   :  { %2578 = vmatpush1.bf16.msra.mxu1 %v3609_v43  ;;  %2536 = vmatprep.subr.bf16.mxu0 %v3614_v44  ;;  %v3699_v43 = vld [vmem:[#allocation5 + $0x670] ss:$48 sps:$4 sm:$0xff]   ;;  %v3704_v44 = vld [vmem:[#allocation5 + $0x14] ss:$48 sps:$4 sm:$0xff]  }
  0x88   :  { %2579 = vmatprep.subr.bf16.mxu1 %v3617_v45  ;;  %v3707_v45 = vld [vmem:[#allocation5 + $0x614] ss:$48 sps:$4 sm:$0xff]  }
  0x8a   :  { %2537 = vmatpush2.bf16.msra.mxu0 %v3612_v46  ;;  %v3702_v46 = vld [vmem:[#allocation5 + $0x10] ss:$48 sps:$4 sm:$0xff]  }
  0x8b   :  { %2580 = vmatpush2.bf16.msra.mxu1 %v3615_v47  ;;  %2538 = vmatprep.subr.bf16.mxu0 %v3620_v48  ;;  %v3705_v47 = vld [vmem:[#allocation5 + $0x610] ss:$48 sps:$4 sm:$0xff]   ;;  %v3710_v48 = vld [vmem:[#allocation5 + $0x5b4] ss:$48 sps:$4 sm:$0xff]  }
  0x8c   :  { %2581 = vmatprep.subr.bf16.mxu1 %v3623_v49  ;;  %v3713_v49 = vld [vmem:[#allocation5 + $0xbb4] ss:$48 sps:$4 sm:$0xff]  }
  0x8e   :  { %2539 = vmatpush2.bf16.msra.mxu0 %v3618_v50  ;;  %v3708_v50 = vld [vmem:[#allocation5 + $0x5b0] ss:$48 sps:$4 sm:$0xff]  }
  0x8f   :  { %2582 = vmatpush2.bf16.msra.mxu1 %v3621_v51  ;;  %2540 = vmatprep.subr.bf16.mxu0 %v3626_v52  ;;  %v3711_v51 = vld [vmem:[#allocation5 + $0xbb0] ss:$48 sps:$4 sm:$0xff]   ;;  %v3716_v52 = vld [vmem:[#allocation5 + $0x554] ss:$48 sps:$4 sm:$0xff]  }
  0x90   :  { %2583 = vmatprep.subr.bf16.mxu1 %v3629_v55  ;;  %v3719_v55 = vld [vmem:[#allocation5 + $0xb54] ss:$48 sps:$4 sm:$0xff]  }
  0x92   :  { %2541 = vmatpush2.bf16.msra.mxu0 %v3624_v56  ;;  %v3714_v56 = vld [vmem:[#allocation5 + $0x550] ss:$48 sps:$4 sm:$0xff]  }
  0x93   :  { %2584 = vmatpush2.bf16.msra.mxu1 %v3627_v57  ;;  %2542 = vmatprep.subr.bf16.mxu0 %v3632_v58  ;;  %v3717_v57 = vld [vmem:[#allocation5 + $0xb50] ss:$48 sps:$4 sm:$0xff]   ;;  %v3722_v58 = vld [vmem:[#allocation5 + $0x4f4] ss:$48 sps:$4 sm:$0xff]  }
  0x94   :  { %2585 = vmatprep.subr.bf16.mxu1 %v3635_v59  ;;  %v3725_v59 = vld [vmem:[#allocation5 + $0xaf4] ss:$48 sps:$4 sm:$0xff]  }
  0x96   :  { %2543 = vmatpush2.bf16.msra.mxu0 %v3630_v60  ;;  %v3720_v60 = vld [vmem:[#allocation5 + $0x4f0] ss:$48 sps:$4 sm:$0xff]  }
  0x97   :  { %2586 = vmatpush2.bf16.msra.mxu1 %v3633_v61  ;;  %2544 = vmatprep.subr.bf16.mxu0 %v3638_v62  ;;  %v3723_v61 = vld [vmem:[#allocation5 + $0xaf0] ss:$48 sps:$4 sm:$0xff]   ;;  %v3728_v62 = vld [vmem:[#allocation5 + $0x494] ss:$48 sps:$4 sm:$0xff]  }
  0x98   :  { %2587 = vmatprep.subr.bf16.mxu1 %v3641_v63  ;;  %v3731_v63 = vld [vmem:[#allocation5 + $0xa94] ss:$48 sps:$4 sm:$0xff]  }
  0x9a   :  { %2545 = vmatpush2.bf16.msra.mxu0 %v3636_v0  ;;  %v3726_v0 = vld [vmem:[#allocation5 + $0x490] ss:$48 sps:$4 sm:$0xff]  }
  0x9b   :  { %2588 = vmatpush2.bf16.msra.mxu1 %v3639_v1  ;;  %2546 = vmatprep.subr.bf16.mxu0 %v3644_v2  ;;  %v3729_v1 = vld [vmem:[#allocation5 + $0xa90] ss:$48 sps:$4 sm:$0xff]   ;;  %v3734_v2 = vld [vmem:[#allocation5 + $0x434] ss:$48 sps:$4 sm:$0xff]  }
  0x9c   :  { %2589 = vmatprep.subr.bf16.mxu1 %v3647_v3  ;;  %v3737_v3 = vld [vmem:[#allocation5 + $0xa34] ss:$48 sps:$4 sm:$0xff]  }
  0x9e   :  { %2547 = vmatpush2.bf16.msra.mxu0 %v3642_v4  ;;  %v3732_v4 = vld [vmem:[#allocation5 + $0x430] ss:$48 sps:$4 sm:$0xff]  }
  0x9f   :  { %2590 = vmatpush2.bf16.msra.mxu1 %v3645_v5  ;;  %2548 = vmatprep.subr.bf16.mxu0 %v3650_v6  ;;  %v3735_v5 = vld [vmem:[#allocation5 + $0xa30] ss:$48 sps:$4 sm:$0xff]   ;;  %v3740_v6 = vld [vmem:[#allocation5 + $0x3d4] ss:$48 sps:$4 sm:$0xff]  }
  0xa0   :  { %2591 = vmatprep.subr.bf16.mxu1 %v3653_v7  ;;  %v3743_v7 = vld [vmem:[#allocation5 + $0x9d4] ss:$48 sps:$4 sm:$0xff]  }
  0xa2   :  { %2549 = vmatpush2.bf16.msra.mxu0 %v3648_v8  ;;  %v3738_v8 = vld [vmem:[#allocation5 + $0x3d0] ss:$48 sps:$4 sm:$0xff]  }
  0xa3   :  { %2592 = vmatpush2.bf16.msra.mxu1 %v3651_v9  ;;  %2550 = vmatprep.subr.bf16.mxu0 %v3656_v10  ;;  %v3741_v9 = vld [vmem:[#allocation5 + $0x9d0] ss:$48 sps:$4 sm:$0xff]   ;;  %v3746_v10 = vld [vmem:[#allocation5 + $0x374] ss:$48 sps:$4 sm:$0xff]  }
  0xa4   :  { %2593 = vmatprep.subr.bf16.mxu1 %v3659_v11  ;;  %v3749_v11 = vld [vmem:[#allocation5 + $0x974] ss:$48 sps:$4 sm:$0xff]  }
  0xa6   :  { %2551 = vmatpush2.bf16.msra.mxu0 %v3654_v14  ;;  %v3744_v14 = vld [vmem:[#allocation5 + $0x370] ss:$48 sps:$4 sm:$0xff]  }
  0xa7   :  { %2594 = vmatpush2.bf16.msra.mxu1 %v3657_v15  ;;  %2606 = vmatprep.subr.bf16.mxu0 %v3662_v16  ;;  %v3747_v15 = vld [vmem:[#allocation5 + $0x970] ss:$48 sps:$4 sm:$0xff]   ;;  %v3752_v16 = vld [vmem:[#allocation5 + $0x314] ss:$48 sps:$4 sm:$0xff]  }
  0xa8   :  { %2649 = vmatprep.subr.bf16.mxu1 %v3665_v17  ;;  %v3755_v17 = vld [vmem:[#allocation5 + $0x914] ss:$48 sps:$4 sm:$0xff]  }
  0xa9   :  { %2553 = vmatmul.mubr.bf16.vlgmr.msra.gmra.mxu0 %v4176_v12 }
  0xaa   :  { %2596 = vmatmul.mubr.bf16.vlgmr.msra.gmra.mxu1 %v4178_v13  ;;  %2607 = vmatpush1.bf16.msra.mxu0 %v3660_v18  ;;  %v3750_v18 = vld [vmem:[#allocation5 + $0x310] ss:$48 sps:$4 sm:$0xff]  }
  0xab   :  { %2650 = vmatpush1.bf16.msra.mxu1 %v3663_v19  ;;  %2608 = vmatprep.subr.bf16.mxu0 %v3668_v20  ;;  %v3753_v19 = vld [vmem:[#allocation5 + $0x910] ss:$48 sps:$4 sm:$0xff]   ;;  %v3758_v20 = vld [vmem:[#allocation5 + $0x2bc] ss:$48 sps:$4 sm:$0xff]  }
  0xac   :  { %2651 = vmatprep.subr.bf16.mxu1 %v3671_v21  ;;  %2638 = vmatprep.mubr.bf16.mxu0 %v4170_v53  ;;  %v3761_v21 = vld [vmem:[#allocation5 + $0x8bc] ss:$48 sps:$4 sm:$0xff]  }
  0xad   :  { %2681 = vmatprep.mubr.bf16.mxu1 %v4172_v54 }
  0xae   :  { %2609 = vmatpush1.bf16.msra.mxu0 %v3666_v22  ;;  %v3756_v22 = vld [vmem:[#allocation5 + $0x2b8] ss:$48 sps:$4 sm:$0xff]  }
  0xaf   :  { %2652 = vmatpush1.bf16.msra.mxu1 %v3669_v23  ;;  %2610 = vmatprep.subr.bf16.mxu0 %v3674_v24  ;;  %v3759_v23 = vld [vmem:[#allocation5 + $0x8b8] ss:$48 sps:$4 sm:$0xff]   ;;  %v3764_v24 = vld [vmem:[#allocation5 + $0x25c] ss:$48 sps:$4 sm:$0xff]  }
  0xb0   :  { %2653 = vmatprep.subr.bf16.mxu1 %v3677_v25  ;;  %v3767_v25 = vld [vmem:[#allocation5 + $0x85c] ss:$48 sps:$4 sm:$0xff]  }
  0xb2   :  { %2611 = vmatpush1.bf16.msra.mxu0 %v3672_v26  ;;  %v3762_v26 = vld [vmem:[#allocation5 + $0x258] ss:$48 sps:$4 sm:$0xff]  }
  0xb3   :  { %2654 = vmatpush1.bf16.msra.mxu1 %v3675_v27  ;;  %2612 = vmatprep.subr.bf16.mxu0 %v3680_v28  ;;  %v3765_v27 = vld [vmem:[#allocation5 + $0x858] ss:$48 sps:$4 sm:$0xff]   ;;  %v3770_v28 = vld [vmem:[#allocation5 + $0x1fc] ss:$48 sps:$4 sm:$0xff]  }
  0xb4   :  { %2655 = vmatprep.subr.bf16.mxu1 %v3683_v29  ;;  %v3773_v29 = vld [vmem:[#allocation5 + $0x7fc] ss:$48 sps:$4 sm:$0xff]  }
  0xb6   :  { %2613 = vmatpush1.bf16.msra.mxu0 %v3678_v30  ;;  %v3768_v30 = vld [vmem:[#allocation5 + $0x1f8] ss:$48 sps:$4 sm:$0xff]  }
  0xb7   :  { %2656 = vmatpush1.bf16.msra.mxu1 %v3681_v31  ;;  %2614 = vmatprep.subr.bf16.mxu0 %v3686_v32  ;;  %v3771_v31 = vld [vmem:[#allocation5 + $0x7f8] ss:$48 sps:$4 sm:$0xff]   ;;  %v3776_v32 = vld [vmem:[#allocation5 + $0x19c] ss:$48 sps:$4 sm:$0xff]  }
  0xb8   :  { %2657 = vmatprep.subr.bf16.mxu1 %v3689_v33  ;;  %v3779_v33 = vld [vmem:[#allocation5 + $0x79c] ss:$48 sps:$4 sm:$0xff]  }
  0xba   :  { %2615 = vmatpush1.bf16.msra.mxu0 %v3684_v34  ;;  %v3774_v34 = vld [vmem:[#allocation5 + $0x198] ss:$48 sps:$4 sm:$0xff]  }
  0xbb   :  { %2658 = vmatpush1.bf16.msra.mxu1 %v3687_v35  ;;  %2616 = vmatprep.subr.bf16.mxu0 %v3692_v36  ;;  %v3777_v35 = vld [vmem:[#allocation5 + $0x798] ss:$48 sps:$4 sm:$0xff]   ;;  %v3782_v36 = vld [vmem:[#allocation5 + $0x13c] ss:$48 sps:$4 sm:$0xff]  }
  0xbc   :  { %2659 = vmatprep.subr.bf16.mxu1 %v3695_v37  ;;  %v3785_v37 = vld [vmem:[#allocation5 + $0x73c] ss:$48 sps:$4 sm:$0xff]  }
  0xbe   :  { %2617 = vmatpush1.bf16.msra.mxu0 %v3690_v38  ;;  %v3780_v38 = vld [vmem:[#allocation5 + $0x138] ss:$48 sps:$4 sm:$0xff]  }
  0xbf   :  { %2660 = vmatpush1.bf16.msra.mxu1 %v3693_v39  ;;  %2618 = vmatprep.subr.bf16.mxu0 %v3698_v40  ;;  %v3783_v39 = vld [vmem:[#allocation5 + $0x738] ss:$48 sps:$4 sm:$0xff]   ;;  %v3788_v40 = vld [vmem:[#allocation5 + $0xdc] ss:$48 sps:$4 sm:$0xff]  }
  0xc0   :  { %2661 = vmatprep.subr.bf16.mxu1 %v3701_v41  ;;  %v3791_v41 = vld [vmem:[#allocation5 + $0x6dc] ss:$48 sps:$4 sm:$0xff]  }
  0xc2   :  { %2619 = vmatpush1.bf16.msra.mxu0 %v3696_v42  ;;  %v3786_v42 = vld [vmem:[#allocation5 + $0xd8] ss:$48 sps:$4 sm:$0xff]  }
  0xc3   :  { %2662 = vmatpush1.bf16.msra.mxu1 %v3699_v43  ;;  %2620 = vmatprep.subr.bf16.mxu0 %v3704_v44  ;;  %v3789_v43 = vld [vmem:[#allocation5 + $0x6d8] ss:$48 sps:$4 sm:$0xff]   ;;  %v3794_v44 = vld [vmem:[#allocation5 + $0x7c] ss:$48 sps:$4 sm:$0xff]  }
  0xc4   :  { %2663 = vmatprep.subr.bf16.mxu1 %v3707_v45  ;;  %v3797_v45 = vld [vmem:[#allocation5 + $0x67c] ss:$48 sps:$4 sm:$0xff]  }
  0xc6   :  { %2621 = vmatpush1.bf16.msra.mxu0 %v3702_v46  ;;  %v3792_v46 = vld [vmem:[#allocation5 + $0x78] ss:$48 sps:$4 sm:$0xff]  }
  0xc7   :  { %2664 = vmatpush1.bf16.msra.mxu1 %v3705_v47  ;;  %2622 = vmatprep.subr.bf16.mxu0 %v3710_v48  ;;  %v3795_v47 = vld [vmem:[#allocation5 + $0x678] ss:$48 sps:$4 sm:$0xff]   ;;  %v3800_v48 = vld [vmem:[#allocation5 + $0x1c] ss:$48 sps:$4 sm:$0xff]  }
  0xc8   :  { %2665 = vmatprep.subr.bf16.mxu1 %v3713_v49  ;;  %v3803_v49 = vld [vmem:[#allocation5 + $0x61c] ss:$48 sps:$4 sm:$0xff]  }
  0xca   :  { %2623 = vmatpush2.bf16.msra.mxu0 %v3708_v50  ;;  %v3798_v50 = vld [vmem:[#allocation5 + $0x18] ss:$48 sps:$4 sm:$0xff]  }
  0xcb   :  { %2666 = vmatpush2.bf16.msra.mxu1 %v3711_v51  ;;  %2624 = vmatprep.subr.bf16.mxu0 %v3716_v52  ;;  %v3801_v51 = vld [vmem:[#allocation5 + $0x618] ss:$48 sps:$4 sm:$0xff]   ;;  %v3806_v52 = vld [vmem:[#allocation5 + $0x5bc] ss:$48 sps:$4 sm:$0xff]  }
  0xcc   :  { %2667 = vmatprep.subr.bf16.mxu1 %v3719_v55  ;;  %v3809_v55 = vld [vmem:[#allocation5 + $0xbbc] ss:$48 sps:$4 sm:$0xff]  }
  0xce   :  { %2625 = vmatpush2.bf16.msra.mxu0 %v3714_v56  ;;  %v3804_v56 = vld [vmem:[#allocation5 + $0x5b8] ss:$48 sps:$4 sm:$0xff]  }
  0xcf   :  { %2668 = vmatpush2.bf16.msra.mxu1 %v3717_v57  ;;  %2626 = vmatprep.subr.bf16.mxu0 %v3722_v58  ;;  %v3807_v57 = vld [vmem:[#allocation5 + $0xbb8] ss:$48 sps:$4 sm:$0xff]   ;;  %v3812_v58 = vld [vmem:[#allocation5 + $0x55c] ss:$48 sps:$4 sm:$0xff]  }
  0xd0   :  { %2669 = vmatprep.subr.bf16.mxu1 %v3725_v59  ;;  %v3815_v59 = vld [vmem:[#allocation5 + $0xb5c] ss:$48 sps:$4 sm:$0xff]  }
  0xd2   :  { %2627 = vmatpush2.bf16.msra.mxu0 %v3720_v60  ;;  %v3810_v60 = vld [vmem:[#allocation5 + $0x558] ss:$48 sps:$4 sm:$0xff]  }
  0xd3   :  { %2670 = vmatpush2.bf16.msra.mxu1 %v3723_v61  ;;  %2628 = vmatprep.subr.bf16.mxu0 %v3728_v62  ;;  %v3813_v61 = vld [vmem:[#allocation5 + $0xb58] ss:$48 sps:$4 sm:$0xff]   ;;  %v3818_v62 = vld [vmem:[#allocation5 + $0x4fc] ss:$48 sps:$4 sm:$0xff]  }
  0xd4   :  { %2671 = vmatprep.subr.bf16.mxu1 %v3731_v63  ;;  %v3821_v63 = vld [vmem:[#allocation5 + $0xafc] ss:$48 sps:$4 sm:$0xff]  }
  0xd6   :  { %2629 = vmatpush2.bf16.msra.mxu0 %v3726_v0  ;;  %v3816_v0 = vld [vmem:[#allocation5 + $0x4f8] ss:$48 sps:$4 sm:$0xff]  }
  0xd7   :  { %2672 = vmatpush2.bf16.msra.mxu1 %v3729_v1  ;;  %2630 = vmatprep.subr.bf16.mxu0 %v3734_v2  ;;  %v3819_v1 = vld [vmem:[#allocation5 + $0xaf8] ss:$48 sps:$4 sm:$0xff]   ;;  %v3824_v2 = vld [vmem:[#allocation5 + $0x49c] ss:$48 sps:$4 sm:$0xff]  }
  0xd8   :  { %2673 = vmatprep.subr.bf16.mxu1 %v3737_v3  ;;  %v3827_v3 = vld [vmem:[#allocation5 + $0xa9c] ss:$48 sps:$4 sm:$0xff]  }
  0xda   :  { %2631 = vmatpush2.bf16.msra.mxu0 %v3732_v4  ;;  %v3822_v4 = vld [vmem:[#allocation5 + $0x498] ss:$48 sps:$4 sm:$0xff]  }
  0xdb   :  { %2674 = vmatpush2.bf16.msra.mxu1 %v3735_v5  ;;  %2632 = vmatprep.subr.bf16.mxu0 %v3740_v6  ;;  %v3825_v5 = vld [vmem:[#allocation5 + $0xa98] ss:$48 sps:$4 sm:$0xff]   ;;  %v3830_v6 = vld [vmem:[#allocation5 + $0x43c] ss:$48 sps:$4 sm:$0xff]  }
  0xdc   :  { %2675 = vmatprep.subr.bf16.mxu1 %v3743_v7  ;;  %v3833_v7 = vld [vmem:[#allocation5 + $0xa3c] ss:$48 sps:$4 sm:$0xff]  }
  0xde   :  { %2633 = vmatpush2.bf16.msra.mxu0 %v3738_v8  ;;  %v3828_v8 = vld [vmem:[#allocation5 + $0x438] ss:$48 sps:$4 sm:$0xff]  }
  0xdf   :  { %2676 = vmatpush2.bf16.msra.mxu1 %v3741_v9  ;;  %2634 = vmatprep.subr.bf16.mxu0 %v3746_v10  ;;  %v3831_v9 = vld [vmem:[#allocation5 + $0xa38] ss:$48 sps:$4 sm:$0xff]   ;;  %v3836_v10 = vld [vmem:[#allocation5 + $0x3dc] ss:$48 sps:$4 sm:$0xff]  }
  0xe0   :  { %2677 = vmatprep.subr.bf16.mxu1 %v3749_v11  ;;  %v3839_v11 = vld [vmem:[#allocation5 + $0x9dc] ss:$48 sps:$4 sm:$0xff]  }
  0xe2   :  { %2635 = vmatpush2.bf16.msra.mxu0 %v3744_v14  ;;  %v3834_v14 = vld [vmem:[#allocation5 + $0x3d8] ss:$48 sps:$4 sm:$0xff]  }
  0xe3   :  { %2678 = vmatpush2.bf16.msra.mxu1 %v3747_v15  ;;  %2636 = vmatprep.subr.bf16.mxu0 %v3752_v16  ;;  %v3837_v15 = vld [vmem:[#allocation5 + $0x9d8] ss:$48 sps:$4 sm:$0xff]   ;;  %v454_v16 = vlaneseq }
  0xe4   :  { %2679 = vmatprep.subr.bf16.mxu1 %v3755_v17  ;;  %v3842_v17 = vld [vmem:[#allocation5 + $0x37c] ss:$48 sps:$4 sm:$0xff]  }
  0xe6   :  { %2637 = vmatpush2.bf16.msra.mxu0 %v3750_v18  ;;  %v3845_v18 = vld [vmem:[#allocation5 + $0x97c] ss:$48 sps:$4 sm:$0xff]  }
  0xe7   :  { %2680 = vmatpush2.bf16.msra.mxu1 %v3753_v19  ;;  %2692 = vmatprep.subr.bf16.mxu0 %v3758_v20  ;;  %v3840_v19 = vld [vmem:[#allocation5 + $0x378] ss:$48 sps:$4 sm:$0xff]  }
  0xe8   :  { %2735 = vmatprep.subr.bf16.mxu1 %v3761_v21  ;;  %v3843_v20 = vld [vmem:[#allocation5 + $0x978] ss:$48 sps:$4 sm:$0xff]   ;;  %v4192_v21 = vshrl.u32 %v454_v16, 7  ;;  %v3891_v16 = vld [vmem:[#allocation5 + $0x680] ss:$48 sps:$4 sm:$0xff]  }
  0xe9   :  { %2639 = vmatmul.mubr.bf16.vlgmr.msra.gmra.mxu0 %v4176_v12 }
  0xea   :  { %2682 = vmatmul.mubr.bf16.vlgmr.msra.gmra.mxu1 %v4178_v13  ;;  %2693 = vmatpush1.bf16.msra.mxu0 %v3756_v22  ;;  %v3848_v22 = vld [vmem:[#allocation5 + $0x31c] ss:$48 sps:$4 sm:$0xff]  }
  0xeb   :  { %2736 = vmatpush1.bf16.msra.mxu1 %v3759_v23  ;;  %2694 = vmatprep.subr.bf16.mxu0 %v3764_v24  ;;  %v3851_v23 = vld [vmem:[#allocation5 + $0x91c] ss:$48 sps:$4 sm:$0xff]   ;;  %v3846_v24 = vld [vmem:[#allocation5 + $0x318] ss:$48 sps:$4 sm:$0xff]  }
  0xec   :  { %2737 = vmatprep.subr.bf16.mxu1 %v3767_v25  ;;  %2724 = vmatprep.mubr.bf16.mxu0 %v4170_v53  ;;  %v3849_v25 = vld [vmem:[#allocation5 + $0x918] ss:$48 sps:$4 sm:$0xff]  }
  0xed   :  { %2767 = vmatprep.mubr.bf16.mxu1 %v4172_v54 }
  0xee   :  { %2695 = vmatpush1.bf16.msra.mxu0 %v3762_v26  ;;  %v4194_v26 = vld [vmem:[#allocation7] sm:$0xff] }
  0xef   :  { %2738 = vmatpush1.bf16.msra.mxu1 %v3765_v27  ;;  %2696 = vmatprep.subr.bf16.mxu0 %v3770_v28  ;;  %v456_v27 = vsub.s32 0, %v4192_v21  ;;  %v3854_v28 = vld [vmem:[#allocation5 + $0x2c4] ss:$48 sps:$4 sm:$0xff]  }
  0xf0   :  { %2739 = vmatprep.subr.bf16.mxu1 %v3773_v29  ;;  %v3857_v29 = vld [vmem:[#allocation5 + $0x8c4] ss:$48 sps:$4 sm:$0xff]  }
  0xf2   :  { %2697 = vmatpush1.bf16.msra.mxu0 %v3768_v30  ;;  %v460_v30 = vsub.s32 1, %v4192_v21 }
  0xf3   :  { %2740 = vmatpush1.bf16.msra.mxu1 %v3771_v31  ;;  %2698 = vmatprep.subr.bf16.mxu0 %v3776_v32  ;;  %v3852_v31 = vld [vmem:[#allocation5 + $0x2c0] ss:$48 sps:$4 sm:$0xff]   ;;  %v457_v32 = vrot.slane %v4194_v26, %v456_v27 }
  0xf4   :  { %2741 = vmatprep.subr.bf16.mxu1 %v3779_v33  ;;  %v3855_v33 = vld [vmem:[#allocation5 + $0x8c0] ss:$48 sps:$4 sm:$0xff]  }
  0xf6   :  { %2699 = vmatpush1.bf16.msra.mxu0 %v3774_v34  ;;  %v3860_v34 = vld [vmem:[#allocation5 + $0x264] ss:$48 sps:$4 sm:$0xff]  }
  0xf7   :  { %2742 = vmatpush1.bf16.msra.mxu1 %v3777_v35  ;;  %2700 = vmatprep.subr.bf16.mxu0 %v3782_v36  ;;  %v3863_v35 = vld [vmem:[#allocation5 + $0x864] ss:$48 sps:$4 sm:$0xff]   ;;  %v461_v36 = vrot.slane %v4194_v26, %v460_v30 }
  0xf8   :  { %2743 = vmatprep.subr.bf16.mxu1 %v3785_v37 }
  0xfa   :  { %2701 = vmatpush1.bf16.msra.mxu0 %v3780_v38 }
  0xfb   :  { %2744 = vmatpush1.bf16.msra.mxu1 %v3783_v39  ;;  %2702 = vmatprep.subr.bf16.mxu0 %v3788_v40  ;;  %v3858_v40 = vld [vmem:[#allocation5 + $0x260] ss:$48 sps:$4 sm:$0xff]  }
  0xfc   :  { %2745 = vmatprep.subr.bf16.mxu1 %v3791_v41  ;;  %v3861_v41 = vld [vmem:[#allocation5 + $0x860] ss:$48 sps:$4 sm:$0xff]  }
  0xfe   :  { %2703 = vmatpush1.bf16.msra.mxu0 %v3786_v42 }
  0xff   :  { %2746 = vmatpush1.bf16.msra.mxu1 %v3789_v43  ;;  %2704 = vmatprep.subr.bf16.mxu0 %v3794_v44  ;;  %v3866_v44 = vld [vmem:[#allocation5 + $0x204] ss:$48 sps:$4 sm:$0xff]  }
 0x100   :  { %2747 = vmatprep.subr.bf16.mxu1 %v3797_v45  ;;  %v3869_v45 = vld [vmem:[#allocation5 + $0x804] ss:$48 sps:$4 sm:$0xff]  }
 0x102   :  { %2705 = vmatpush1.bf16.msra.mxu0 %v3792_v46 }
 0x103   :  { %2748 = vmatpush1.bf16.msra.mxu1 %v3795_v47  ;;  %2706 = vmatprep.subr.bf16.mxu0 %v3800_v48 }
 0x104   :  { %2749 = vmatprep.subr.bf16.mxu1 %v3803_v49 }
 0x106   :  { %2707 = vmatpush1.bf16.msra.mxu0 %v3798_v50 }
 0x107   :  { %2750 = vmatpush1.bf16.msra.mxu1 %v3801_v51  ;;  %2708 = vmatprep.subr.bf16.mxu0 %v3806_v52  ;;  %v3864_v52 = vld [vmem:[#allocation5 + $0x200] ss:$48 sps:$4 sm:$0xff]  }
 0x108   :  { %2751 = vmatprep.subr.bf16.mxu1 %v3809_v55  ;;  %v3867_v55 = vld [vmem:[#allocation5 + $0x800] ss:$48 sps:$4 sm:$0xff]  }
 0x10a   :  { %2709 = vmatpush2.bf16.msra.mxu0 %v3804_v56 }
 0x10b   :  { %2752 = vmatpush2.bf16.msra.mxu1 %v3807_v57  ;;  %2710 = vmatprep.subr.bf16.mxu0 %v3812_v58  ;;  %v3872_v57 = vld [vmem:[#allocation5 + $0x1a4] ss:$48 sps:$4 sm:$0xff]  }
 0x10c   :  { %2753 = vmatprep.subr.bf16.mxu1 %v3815_v59  ;;  %v3875_v58 = vld [vmem:[#allocation5 + $0x7a4] ss:$48 sps:$4 sm:$0xff]  }
 0x10e   :  { %2711 = vmatpush2.bf16.msra.mxu0 %v3810_v60 }
 0x10f   :  { %2754 = vmatpush2.bf16.msra.mxu1 %v3813_v61  ;;  %2712 = vmatprep.subr.bf16.mxu0 %v3818_v62 }
 0x110   :  { %2755 = vmatprep.subr.bf16.mxu1 %v3821_v63 }
 0x112   :  { %2713 = vmatpush2.bf16.msra.mxu0 %v3816_v0  ;;  %v3870_v0 = vld [vmem:[#allocation5 + $0x1a0] ss:$48 sps:$4 sm:$0xff]  }
 0x113   :  { %2756 = vmatpush2.bf16.msra.mxu1 %v3819_v1  ;;  %2714 = vmatprep.subr.bf16.mxu0 %v3824_v2  ;;  %v3873_v1 = vld [vmem:[#allocation5 + $0x7a0] ss:$48 sps:$4 sm:$0xff]   ;;  %v3878_v2 = vld [vmem:[#allocation5 + $0x144] ss:$48 sps:$4 sm:$0xff]  }
 0x114   :  { %2757 = vmatprep.subr.bf16.mxu1 %v3827_v3  ;;  %v3881_v3 = vld [vmem:[#allocation5 + $0x744] ss:$48 sps:$4 sm:$0xff]  }
 0x116   :  { %2715 = vmatpush2.bf16.msra.mxu0 %v3822_v4 }
 0x117   :  { %2758 = vmatpush2.bf16.msra.mxu1 %v3825_v5  ;;  %2716 = vmatprep.subr.bf16.mxu0 %v3830_v6  ;;  %v3876_v5 = vld [vmem:[#allocation5 + $0x140] ss:$48 sps:$4 sm:$0xff]  }
 0x118   :  { %2759 = vmatprep.subr.bf16.mxu1 %v3833_v7  ;;  %v3879_v6 = vld [vmem:[#allocation5 + $0x740] ss:$48 sps:$4 sm:$0xff]   ;;  %v3884_v7 = vld [vmem:[#allocation5 + $0xe4] ss:$48 sps:$4 sm:$0xff]  }
 0x11a   :  { %2717 = vmatpush2.bf16.msra.mxu0 %v3828_v8  ;;  %v3887_v8 = vld [vmem:[#allocation5 + $0x6e4] ss:$48 sps:$4 sm:$0xff]  }
 0x11b   :  { %2760 = vmatpush2.bf16.msra.mxu1 %v3831_v9  ;;  %2718 = vmatprep.subr.bf16.mxu0 %v3836_v10  ;;  %v3882_v9 = vld [vmem:[#allocation5 + $0xe0] ss:$48 sps:$4 sm:$0xff]  }
 0x11c   :  { %2761 = vmatprep.subr.bf16.mxu1 %v3839_v11  ;;  %v3885_v10 = vld [vmem:[#allocation5 + $0x6e0] ss:$48 sps:$4 sm:$0xff]   ;;  %v3890_v11 = vld [vmem:[#allocation5 + $0x84] ss:$48 sps:$4 sm:$0xff]  }
 0x11e   :  { %2719 = vmatpush2.bf16.msra.mxu0 %v3834_v14  ;;  %v3893_v14 = vld [vmem:[#allocation5 + $0x684] ss:$48 sps:$4 sm:$0xff]  }
 0x11f   :  { %2762 = vmatpush2.bf16.msra.mxu1 %v3837_v15  ;;  %2720 = vmatprep.subr.bf16.mxu0 %v3842_v17  ;;  %v3888_v15 = vld [vmem:[#allocation5 + $0x80] ss:$48 sps:$4 sm:$0xff]   ;;  %v3896_v17 = vld [vmem:[#allocation5 + $0x24] ss:$48 sps:$4 sm:$0xff]  }
 0x120   :  { %2763 = vmatprep.subr.bf16.mxu1 %v3845_v18  ;;  %v3899_v18 = vld [vmem:[#allocation5 + $0x624] ss:$48 sps:$4 sm:$0xff]  }
 0x122   :  { %2721 = vmatpush2.bf16.msra.mxu0 %v3840_v19  ;;  %v3894_v19 = vld [vmem:[#allocation5 + $0x20] ss:$48 sps:$4 sm:$0xff]  }
 0x123   :  { %2764 = vmatpush2.bf16.msra.mxu1 %v3843_v20  ;;  %2722 = vmatprep.subr.bf16.mxu0 %v3848_v22  ;;  %v3897_v20 = vld [vmem:[#allocation5 + $0x620] ss:$48 sps:$4 sm:$0xff]   ;;  %v3902_v22 = vld [vmem:[#allocation5 + $0x5c4] ss:$48 sps:$4 sm:$0xff]  }
 0x124   :  { %2765 = vmatprep.subr.bf16.mxu1 %v3851_v23  ;;  %v3905_v23 = vld [vmem:[#allocation5 + $0xbc4] ss:$48 sps:$4 sm:$0xff]  }
 0x126   :  { %2723 = vmatpush2.bf16.msra.mxu0 %v3846_v24  ;;  %v3900_v24 = vld [vmem:[#allocation5 + $0x5c0] ss:$48 sps:$4 sm:$0xff]  }
 0x127   :  { %2766 = vmatpush2.bf16.msra.mxu1 %v3849_v25  ;;  %2778 = vmatprep.subr.bf16.mxu0 %v3854_v28  ;;  %v3903_v25 = vld [vmem:[#allocation5 + $0xbc0] ss:$48 sps:$4 sm:$0xff]   ;;  %v3908_v28 = vld [vmem:[#allocation5 + $0x564] ss:$48 sps:$4 sm:$0xff]  }
 0x128   :  { %2821 = vmatprep.subr.bf16.mxu1 %v3857_v29  ;;  %v3911_v29 = vld [vmem:[#allocation5 + $0xb64] ss:$48 sps:$4 sm:$0xff]  }
 0x129   :  { %v2468_v37 = vpop.f32.mrf.mxu0  ;;  %2725 = vmatmul.mubr.bf16.vlgmr.msra.gmra.mxu0 %v4176_v12 }
 0x12a   :  { %v2511_v38 = vpop.f32.mrf.mxu1  ;;  %2768 = vmatmul.mubr.bf16.vlgmr.msra.gmra.mxu1 %v4178_v13  ;;  %v2469_v39 = vadd.f32 %v2468_v37, %v457_v32  ;;  %2779 = vmatpush1.bf16.msra.mxu0 %v3852_v31  ;;  %v3906_v31 = vld [vmem:[#allocation5 + $0x560] ss:$48 sps:$4 sm:$0xff]   ;;  %v3920_v37 = vld [vmem:[#allocation5 + $0x4a4] ss:$48 sps:$4 sm:$0xff]  }
 0x12b   :  { %2822 = vmatpush1.bf16.msra.mxu1 %v3855_v33  ;;  %v2470_v42 = vpop.f32.mrf.mxu0  ;;  %2780 = vmatprep.subr.bf16.mxu0 %v3860_v34  ;;  %v3914_v33 = vld [vmem:[#allocation5 + $0x504] ss:$48 sps:$4 sm:$0xff]  }
 0x12c   :  { %v2513_v43 = vpop.f32.mrf.mxu1  ;;  %2823 = vmatprep.subr.bf16.mxu1 %v3863_v35  ;;  %v2512_v46 = vadd.f32 %v2511_v38, %v2469_v39  ;;  %v2471_v47 = vadd.f32 %v2470_v42, %v461_v36  ;;  %2810 = vmatprep.mubr.bf16.mxu0 %v4170_v53  ;;  %v3917_v34 = vld [vmem:[#allocation5 + $0xb04] ss:$48 sps:$4 sm:$0xff]   ;;  %v3912_v35 = vld [vmem:[#allocation5 + $0x500] ss:$48 sps:$4 sm:$0xff]  }
 0x12d   :  { %2853 = vmatprep.mubr.bf16.mxu1 %v4172_v54  ;;  %v2472_v48 = vpop.f32.mrf.mxu0  ;;  %v3923_v38 = vld [vmem:[#allocation5 + $0xaa4] ss:$48 sps:$4 sm:$0xff]   ;;  %v3918_v39 = vld [vmem:[#allocation5 + $0x4a0] ss:$48 sps:$4 sm:$0xff]  }
 0x12e   :  { %v2515_v49 = vpop.f32.mrf.mxu1  ;;  %v2514_v50 = vadd.f32 %v2513_v43, %v2471_v47  ;;  %v2473_v51 = vadd.f32 %v2472_v48, %v457_v32  ;;  %2781 = vmatpush1.bf16.msra.mxu0 %v3858_v40  ;;  %v3909_v32 = vld [vmem:[#allocation5 + $0xb60] ss:$48 sps:$4 sm:$0xff]   ;;  %v3929_v42 = vld [vmem:[#allocation5 + $0xa44] ss:$48 sps:$4 sm:$0xff]  }
 0x12f   :  { %2824 = vmatpush1.bf16.msra.mxu1 %v3861_v41  ;;  %v2474_v56 = vpop.f32.mrf.mxu0  ;;  %2782 = vmatprep.subr.bf16.mxu0 %v3866_v44  ;;  %v3921_v40 = vld [vmem:[#allocation5 + $0xaa0] ss:$48 sps:$4 sm:$0xff]   ;;  %v3926_v41 = vld [vmem:[#allocation5 + $0x444] ss:$48 sps:$4 sm:$0xff]  }
 0x130   :  { %2825 = vmatprep.subr.bf16.mxu1 %v3869_v45  ;;  %v3448_v59 = vpack.c.bf16 %v2514_v50, %v2512_v46  ;;  %v2475_v60 = vadd.f32 %v2474_v56, %v461_v36  ;;  %v2517_v61 = vpop.f32.mrf.mxu1  ;;  %v2516_v62 = vadd.f32 %v2515_v49, %v2473_v51  ;;  %v3915_v36 = vld [vmem:[#allocation5 + $0xb00] ss:$48 sps:$4 sm:$0xff]   ;;  %v3932_v45 = vld [vmem:[#allocation5 + $0x3e4] ss:$48 sps:$4 sm:$0xff]  }
 0x131   :  { %v3924_v43 = vld [vmem:[#allocation5 + $0x440] ss:$48 sps:$4 sm:$0xff]   ;;  %v3935_v46 = vld [vmem:[#allocation5 + $0x9e4] ss:$48 sps:$4 sm:$0xff]  }
 0x132   :  { %3022 = vst [vmem:[#allocation8] sm:$0xff] %v3448_v59  ;;  %v2518_v63 = vadd.f32 %v2517_v61, %v2475_v60  ;;  %2783 = vmatpush1.bf16.msra.mxu0 %v3864_v52  ;;  %v3927_v44 = vld [vmem:[#allocation5 + $0xa40] ss:$48 sps:$4 sm:$0xff]   ;;  %v3938_v49 = vld [vmem:[#allocation5 + $0x384] ss:$48 sps:$4 sm:$0xff]   ;;  %v464_v59 = vsub.s32 2, %v4192_v21 }
 0x133   :  { %2826 = vmatpush1.bf16.msra.mxu1 %v3867_v55  ;;  %2784 = vmatprep.subr.bf16.mxu0 %v3872_v57  ;;  %v3930_v47 = vld [vmem:[#allocation5 + $0x3e0] ss:$48 sps:$4 sm:$0xff]   ;;  %v3941_v50 = vld [vmem:[#allocation5 + $0x984] ss:$48 sps:$4 sm:$0xff]   ;;  %v3950_v60 = vld [vmem:[#allocation5 + $0x2cc] ss:$48 sps:$4 sm:$0xff]  }
 0x134   :  { %2827 = vmatprep.subr.bf16.mxu1 %v3875_v58  ;;  %v3454_v4 = vpack.c.bf16 %v2518_v63, %v2516_v62  ;;  %v3933_v48 = vld [vmem:[#allocation5 + $0x9e0] ss:$48 sps:$4 sm:$0xff]   ;;  %v3944_v55 = vld [vmem:[#allocation5 + $0x324] ss:$48 sps:$4 sm:$0xff]   ;;  %v3953_v61 = vld [vmem:[#allocation5 + $0x8cc] ss:$48 sps:$4 sm:$0xff]   ;;  %v465_v63 = vrot.slane %v4194_v26, %v464_v59 }
 0x135   :  { %v3936_v51 = vld [vmem:[#allocation5 + $0x380] ss:$48 sps:$4 sm:$0xff]   ;;  %v3947_v56 = vld [vmem:[#allocation5 + $0x924] ss:$48 sps:$4 sm:$0xff]   ;;  %v468_v62 = vsub.s32 3, %v4192_v21 }
 0x136   :  { %3028 = vst [vmem:[#allocation8 + $0x30] sm:$0xff] %v3454_v4  ;;  %2785 = vmatpush1.bf16.msra.mxu0 %v3870_v0  ;;  %v3939_v52 = vld [vmem:[#allocation5 + $0x980] ss:$48 sps:$4 sm:$0xff]   ;;  %v3948_v0 = vld [vmem:[#allocation5 + $0x2c8] ss:$48 sps:$4 sm:$0xff]  }
 0x137   :  { %2828 = vmatpush1.bf16.msra.mxu1 %v3873_v1  ;;  %2786 = vmatprep.subr.bf16.mxu0 %v3878_v2  ;;  %v3942_v57 = vld [vmem:[#allocation5 + $0x320] ss:$48 sps:$4 sm:$0xff]   ;;  %v3951_v1 = vld [vmem:[#allocation5 + $0x8c8] ss:$48 sps:$4 sm:$0xff]   ;;  %v3956_v2 = vld [vmem:[#allocation5 + $0x26c] ss:$48 sps:$4 sm:$0xff]   ;;  %v469_v4 = vrot.slane %v4194_v26, %v468_v62 }
 0x138   :  { %2829 = vmatprep.subr.bf16.mxu1 %v3881_v3  ;;  %v3945_v58 = vld [vmem:[#allocation5 + $0x920] ss:$48 sps:$4 sm:$0xff]   ;;  %v3959_v3 = vld [vmem:[#allocation5 + $0x86c] ss:$48 sps:$4 sm:$0xff]  }
 0x13a   :  { %2787 = vmatpush1.bf16.msra.mxu0 %v3876_v5 }
 0x13b   :  { %2830 = vmatpush1.bf16.msra.mxu1 %v3879_v6  ;;  %2788 = vmatprep.subr.bf16.mxu0 %v3884_v7 }
 0x13c   :  { %2831 = vmatprep.subr.bf16.mxu1 %v3887_v8  ;;  %v3954_v8 = vld [vmem:[#allocation5 + $0x268] ss:$48 sps:$4 sm:$0xff]  }
 0x13e   :  { %2789 = vmatpush1.bf16.msra.mxu0 %v3882_v9  ;;  %v3957_v9 = vld [vmem:[#allocation5 + $0x868] ss:$48 sps:$4 sm:$0xff]  }
 0x13f   :  { %2832 = vmatpush1.bf16.msra.mxu1 %v3885_v10  ;;  %2790 = vmatprep.subr.bf16.mxu0 %v3890_v11 }
 0x140   :  { %2833 = vmatprep.subr.bf16.mxu1 %v3893_v14  ;;  %v3962_v14 = vld [vmem:[#allocation5 + $0x20c] ss:$48 sps:$4 sm:$0xff]  }
 0x142   :  { %2791 = vmatpush1.bf16.msra.mxu0 %v3888_v15  ;;  %v3965_v15 = vld [vmem:[#allocation5 + $0x80c] ss:$48 sps:$4 sm:$0xff]  }
 0x143   :  { %2834 = vmatpush1.bf16.msra.mxu1 %v3891_v16  ;;  %2792 = vmatprep.subr.bf16.mxu0 %v3896_v17 }
 0x144   :  { %2835 = vmatprep.subr.bf16.mxu1 %v3899_v18 }
 0x146   :  { %2793 = vmatpush1.bf16.msra.mxu0 %v3894_v19 }
 0x147   :  { %2836 = vmatpush1.bf16.msra.mxu1 %v3897_v20  ;;  %2794 = vmatprep.subr.bf16.mxu0 %v3902_v22 }
 0x148   :  { %2837 = vmatprep.subr.bf16.mxu1 %v3905_v23  ;;  %v3960_v23 = vld [vmem:[#allocation5 + $0x208] ss:$48 sps:$4 sm:$0xff]  }
 0x14a   :  { %2795 = vmatpush2.bf16.msra.mxu0 %v3900_v24  ;;  %v3963_v24 = vld [vmem:[#allocation5 + $0x808] ss:$48 sps:$4 sm:$0xff]  }
 0x14b   :  { %2838 = vmatpush2.bf16.msra.mxu1 %v3903_v25  ;;  %2796 = vmatprep.subr.bf16.mxu0 %v3908_v28  ;;  %v3968_v28 = vld [vmem:[#allocation5 + $0x1ac] ss:$48 sps:$4 sm:$0xff]  }
 0x14c   :  { %2839 = vmatprep.subr.bf16.mxu1 %v3911_v29  ;;  %v3971_v29 = vld [vmem:[#allocation5 + $0x7ac] ss:$48 sps:$4 sm:$0xff]  }
 0x14e   :  { %2797 = vmatpush2.bf16.msra.mxu0 %v3906_v31 }
 0x14f   :  { %2840 = vmatpush2.bf16.msra.mxu1 %v3909_v32  ;;  %2798 = vmatprep.subr.bf16.mxu0 %v3914_v33 }
 0x150   :  { %2841 = vmatprep.subr.bf16.mxu1 %v3917_v34 }
 0x152   :  { %2799 = vmatpush2.bf16.msra.mxu0 %v3912_v35  ;;  %v3969_v35 = vld [vmem:[#allocation5 + $0x7a8] ss:$48 sps:$4 sm:$0xff]  }
 0x153   :  { %2842 = vmatpush2.bf16.msra.mxu1 %v3915_v36  ;;  %2800 = vmatprep.subr.bf16.mxu0 %v3920_v37  ;;  %v3974_v36 = vld [vmem:[#allocation5 + $0x14c] ss:$48 sps:$4 sm:$0xff]  }
 0x154   :  { %2843 = vmatprep.subr.bf16.mxu1 %v3923_v38  ;;  %v3977_v37 = vld [vmem:[#allocation5 + $0x74c] ss:$48 sps:$4 sm:$0xff]  }
 0x156   :  { %2801 = vmatpush2.bf16.msra.mxu0 %v3918_v39  ;;  %v3972_v39 = vld [vmem:[#allocation5 + $0x148] ss:$48 sps:$4 sm:$0xff]  }
 0x157   :  { %2844 = vmatpush2.bf16.msra.mxu1 %v3921_v40  ;;  %2802 = vmatprep.subr.bf16.mxu0 %v3926_v41  ;;  %v3975_v40 = vld [vmem:[#allocation5 + $0x748] ss:$48 sps:$4 sm:$0xff]   ;;  %v3980_v41 = vld [vmem:[#allocation5 + $0xec] ss:$48 sps:$4 sm:$0xff]  }
 0x158   :  { %2845 = vmatprep.subr.bf16.mxu1 %v3929_v42  ;;  %v3983_v42 = vld [vmem:[#allocation5 + $0x6ec] ss:$48 sps:$4 sm:$0xff]  }
 0x15a   :  { %2803 = vmatpush2.bf16.msra.mxu0 %v3924_v43  ;;  %v3978_v43 = vld [vmem:[#allocation5 + $0xe8] ss:$48 sps:$4 sm:$0xff]  }
 0x15b   :  { %2846 = vmatpush2.bf16.msra.mxu1 %v3927_v44  ;;  %2804 = vmatprep.subr.bf16.mxu0 %v3932_v45  ;;  %v3981_v44 = vld [vmem:[#allocation5 + $0x6e8] ss:$48 sps:$4 sm:$0xff]   ;;  %v3986_v45 = vld [vmem:[#allocation5 + $0x8c] ss:$48 sps:$4 sm:$0xff]  }
 0x15c   :  { %2847 = vmatprep.subr.bf16.mxu1 %v3935_v46  ;;  %v3989_v46 = vld [vmem:[#allocation5 + $0x68c] ss:$48 sps:$4 sm:$0xff]  }
 0x15e   :  { %2805 = vmatpush2.bf16.msra.mxu0 %v3930_v47  ;;  %v3984_v47 = vld [vmem:[#allocation5 + $0x88] ss:$48 sps:$4 sm:$0xff]  }
 0x15f   :  { %2848 = vmatpush2.bf16.msra.mxu1 %v3933_v48  ;;  %2806 = vmatprep.subr.bf16.mxu0 %v3938_v49  ;;  %v3987_v48 = vld [vmem:[#allocation5 + $0x688] ss:$48 sps:$4 sm:$0xff]   ;;  %v3992_v49 = vld [vmem:[#allocation5 + $0x2c] ss:$48 sps:$4 sm:$0xff]  }
 0x160   :  { %2849 = vmatprep.subr.bf16.mxu1 %v3941_v50  ;;  %v3995_v50 = vld [vmem:[#allocation5 + $0x62c] ss:$48 sps:$4 sm:$0xff]  }
 0x162   :  { %2807 = vmatpush2.bf16.msra.mxu0 %v3936_v51  ;;  %v3990_v51 = vld [vmem:[#allocation5 + $0x28] ss:$48 sps:$4 sm:$0xff]  }
 0x163   :  { %2850 = vmatpush2.bf16.msra.mxu1 %v3939_v52  ;;  %2808 = vmatprep.subr.bf16.mxu0 %v3944_v55  ;;  %v3993_v52 = vld [vmem:[#allocation5 + $0x628] ss:$48 sps:$4 sm:$0xff]   ;;  %v3998_v55 = vld [vmem:[#allocation5 + $0x5cc] ss:$48 sps:$4 sm:$0xff]  }
 0x164   :  { %2851 = vmatprep.subr.bf16.mxu1 %v3947_v56  ;;  %v4001_v56 = vld [vmem:[#allocation5 + $0xbcc] ss:$48 sps:$4 sm:$0xff]  }
 0x166   :  { %2809 = vmatpush2.bf16.msra.mxu0 %v3942_v57  ;;  %v3996_v57 = vld [vmem:[#allocation5 + $0x5c8] ss:$48 sps:$4 sm:$0xff]  }
 0x167   :  { %2852 = vmatpush2.bf16.msra.mxu1 %v3945_v58  ;;  %2864 = vmatprep.subr.bf16.mxu0 %v3950_v60  ;;  %v3999_v58 = vld [vmem:[#allocation5 + $0xbc8] ss:$48 sps:$4 sm:$0xff]   ;;  %v4004_v60 = vld [vmem:[#allocation5 + $0x56c] ss:$48 sps:$4 sm:$0xff]  }
 0x168   :  { %2907 = vmatprep.subr.bf16.mxu1 %v3953_v61  ;;  %v4007_v61 = vld [vmem:[#allocation5 + $0xb6c] ss:$48 sps:$4 sm:$0xff]  }
 0x169   :  { %v2554_v5 = vpop.f32.mrf.mxu0  ;;  %2811 = vmatmul.mubr.bf16.vlgmr.msra.gmra.mxu0 %v4176_v12 }
 0x16a   :  { %v2597_v6 = vpop.f32.mrf.mxu1  ;;  %2854 = vmatmul.mubr.bf16.vlgmr.msra.gmra.mxu1 %v4178_v13  ;;  %v2555_v7 = vadd.f32 %v2554_v5, %v465_v63  ;;  %2865 = vmatpush1.bf16.msra.mxu0 %v3948_v0  ;;  %v4005_v0 = vld [vmem:[#allocation5 + $0xb68] ss:$48 sps:$4 sm:$0xff]   ;;  %v4016_v5 = vld [vmem:[#allocation5 + $0x4ac] ss:$48 sps:$4 sm:$0xff]  }
 0x16b   :  { %2908 = vmatpush1.bf16.msra.mxu1 %v3951_v1  ;;  %v2556_v10 = vpop.f32.mrf.mxu0  ;;  %2866 = vmatprep.subr.bf16.mxu0 %v3956_v2  ;;  %v4010_v1 = vld [vmem:[#allocation5 + $0x50c] ss:$48 sps:$4 sm:$0xff]  }
 0x16c   :  { %v2599_v11 = vpop.f32.mrf.mxu1  ;;  %2909 = vmatprep.subr.bf16.mxu1 %v3959_v3  ;;  %v2598_v16 = vadd.f32 %v2597_v6, %v2555_v7  ;;  %v2557_v17 = vadd.f32 %v2556_v10, %v469_v4  ;;  %2896 = vmatprep.mubr.bf16.mxu0 %v4170_v53  ;;  %v4013_v2 = vld [vmem:[#allocation5 + $0xb0c] ss:$48 sps:$4 sm:$0xff]   ;;  %v4008_v3 = vld [vmem:[#allocation5 + $0x508] ss:$48 sps:$4 sm:$0xff]  }
 0x16d   :  { %2939 = vmatprep.mubr.bf16.mxu1 %v4172_v54  ;;  %v2558_v18 = vpop.f32.mrf.mxu0  ;;  %v3966_v54 = vld [vmem:[#allocation5 + $0x1a8] ss:$48 sps:$4 sm:$0xff]   ;;  %v4019_v6 = vld [vmem:[#allocation5 + $0xaac] ss:$48 sps:$4 sm:$0xff]  }
 0x16e   :  { %v2601_v19 = vpop.f32.mrf.mxu1  ;;  %v2600_v20 = vadd.f32 %v2599_v11, %v2557_v17  ;;  %v2559_v22 = vadd.f32 %v2558_v18, %v465_v63  ;;  %2867 = vmatpush1.bf16.msra.mxu0 %v3954_v8  ;;  %v4002_v63 = vld [vmem:[#allocation5 + $0x568] ss:$48 sps:$4 sm:$0xff]   ;;  %v4025_v10 = vld [vmem:[#allocation5 + $0xa4c] ss:$48 sps:$4 sm:$0xff]  }
 0x16f   :  { %2910 = vmatpush1.bf16.msra.mxu1 %v3957_v9  ;;  %v2560_v25 = vpop.f32.mrf.mxu0  ;;  %2868 = vmatprep.subr.bf16.mxu0 %v3962_v14  ;;  %v4014_v7 = vld [vmem:[#allocation5 + $0x4a8] ss:$48 sps:$4 sm:$0xff]   ;;  %v4022_v9 = vld [vmem:[#allocation5 + $0x44c] ss:$48 sps:$4 sm:$0xff]  }
 0x170   :  { %2911 = vmatprep.subr.bf16.mxu1 %v3965_v15  ;;  %v3449_v31 = vpack.c.bf16 %v2600_v20, %v2598_v16  ;;  %v2561_v32 = vadd.f32 %v2560_v25, %v469_v4  ;;  %v2603_v33 = vpop.f32.mrf.mxu1  ;;  %v2602_v53 = vadd.f32 %v2601_v19, %v2559_v22  ;;  %v4011_v4 = vld [vmem:[#allocation5 + $0xb08] ss:$48 sps:$4 sm:$0xff]   ;;  %v4028_v15 = vld [vmem:[#allocation5 + $0x3ec] ss:$48 sps:$4 sm:$0xff]  }
 0x171   :  { %v4017_v8 = vld [vmem:[#allocation5 + $0xaa8] ss:$48 sps:$4 sm:$0xff]   ;;  %v4031_v16 = vld [vmem:[#allocation5 + $0x9ec] ss:$48 sps:$4 sm:$0xff]  }
 0x172   :  { %3023 = vst [vmem:[#allocation8 + $0x8] sm:$0xff] %v3449_v31  ;;  %v2604_v34 = vadd.f32 %v2603_v33, %v2561_v32  ;;  %2869 = vmatpush1.bf16.msra.mxu0 %v3960_v23  ;;  %v4020_v11 = vld [vmem:[#allocation5 + $0x448] ss:$48 sps:$4 sm:$0xff]   ;;  %v4034_v19 = vld [vmem:[#allocation5 + $0x38c] ss:$48 sps:$4 sm:$0xff]   ;;  %v472_v31 = vsub.s32 4, %v4192_v21 }
 0x173   :  { %2912 = vmatpush1.bf16.msra.mxu1 %v3963_v24  ;;  %2870 = vmatprep.subr.bf16.mxu0 %v3968_v28  ;;  %v4023_v14 = vld [vmem:[#allocation5 + $0xa48] ss:$48 sps:$4 sm:$0xff]   ;;  %v4037_v20 = vld [vmem:[#allocation5 + $0x98c] ss:$48 sps:$4 sm:$0xff]   ;;  %v476_v32 = vsub.s32 5, %v4192_v21 }
 0x174   :  { %2913 = vmatprep.subr.bf16.mxu1 %v3971_v29  ;;  %v3455_v38 = vpack.c.bf16 %v2604_v34, %v2602_v53  ;;  %v4026_v17 = vld [vmem:[#allocation5 + $0x3e8] ss:$48 sps:$4 sm:$0xff]   ;;  %v4040_v24 = vld [vmem:[#allocation5 + $0x32c] ss:$48 sps:$4 sm:$0xff]   ;;  %v473_v33 = vrot.slane %v4194_v26, %v472_v31 }
 0x175   :  { %v4029_v18 = vld [vmem:[#allocation5 + $0x9e8] ss:$48 sps:$4 sm:$0xff]   ;;  %v4043_v25 = vld [vmem:[#allocation5 + $0x92c] ss:$48 sps:$4 sm:$0xff]   ;;  %v477_v53 = vrot.slane %v4194_v26, %v476_v32 }
 0x176   :  { %3029 = vst [vmem:[#allocation8 + $0x38] sm:$0xff] %v3455_v38  ;;  %2871 = vmatpush1.bf16.msra.mxu0 %v3966_v54  ;;  %v4032_v22 = vld [vmem:[#allocation5 + $0x388] ss:$48 sps:$4 sm:$0xff]  }
 0x177   :  { %2914 = vmatpush1.bf16.msra.mxu1 %v3969_v35  ;;  %2872 = vmatprep.subr.bf16.mxu0 %v3974_v36  ;;  %v4035_v23 = vld [vmem:[#allocation5 + $0x988] ss:$48 sps:$4 sm:$0xff]  }
 0x178   :  { %2915 = vmatprep.subr.bf16.mxu1 %v3977_v37  ;;  %v4038_v28 = vld [vmem:[#allocation5 + $0x328] ss:$48 sps:$4 sm:$0xff]  }
 0x179   :  { %v4041_v29 = vld [vmem:[#allocation5 + $0x928] ss:$48 sps:$4 sm:$0xff]  }
 0x17a   :  { %2873 = vmatpush1.bf16.msra.mxu0 %v3972_v39 }
 0x17b   :  { %2916 = vmatpush1.bf16.msra.mxu1 %v3975_v40  ;;  %2874 = vmatprep.subr.bf16.mxu0 %v3980_v41 }
 0x17c   :  { %2917 = vmatprep.subr.bf16.mxu1 %v3983_v42 }
 0x17e   :  { %2875 = vmatpush1.bf16.msra.mxu0 %v3978_v43 }
 0x17f   :  { %2918 = vmatpush1.bf16.msra.mxu1 %v3981_v44  ;;  %2876 = vmatprep.subr.bf16.mxu0 %v3986_v45 }
 0x180   :  { %2919 = vmatprep.subr.bf16.mxu1 %v3989_v46 }
 0x182   :  { %2877 = vmatpush1.bf16.msra.mxu0 %v3984_v47 }
 0x183   :  { %2920 = vmatpush1.bf16.msra.mxu1 %v3987_v48  ;;  %2878 = vmatprep.subr.bf16.mxu0 %v3992_v49 }
 0x184   :  { %2921 = vmatprep.subr.bf16.mxu1 %v3995_v50 }
 0x186   :  { %2879 = vmatpush1.bf16.msra.mxu0 %v3990_v51 }
 0x187   :  { %2922 = vmatpush1.bf16.msra.mxu1 %v3993_v52  ;;  %2880 = vmatprep.subr.bf16.mxu0 %v3998_v55 }
 0x188   :  { %2923 = vmatprep.subr.bf16.mxu1 %v4001_v56 }
 0x18a   :  { %2881 = vmatpush2.bf16.msra.mxu0 %v3996_v57 }
 0x18b   :  { %2924 = vmatpush2.bf16.msra.mxu1 %v3999_v58  ;;  %2882 = vmatprep.subr.bf16.mxu0 %v4004_v60 }
 0x18c   :  { %2925 = vmatprep.subr.bf16.mxu1 %v4007_v61 }
 0x18e   :  { %2883 = vmatpush2.bf16.msra.mxu0 %v4002_v63 }
 0x18f   :  { %2926 = vmatpush2.bf16.msra.mxu1 %v4005_v0  ;;  %2884 = vmatprep.subr.bf16.mxu0 %v4010_v1 }
 0x190   :  { %2927 = vmatprep.subr.bf16.mxu1 %v4013_v2 }
 0x192   :  { %2885 = vmatpush2.bf16.msra.mxu0 %v4008_v3 }
 0x193   :  { %2928 = vmatpush2.bf16.msra.mxu1 %v4011_v4  ;;  %2886 = vmatprep.subr.bf16.mxu0 %v4016_v5 }
 0x194   :  { %2929 = vmatprep.subr.bf16.mxu1 %v4019_v6 }
 0x196   :  { %2887 = vmatpush2.bf16.msra.mxu0 %v4014_v7 }
 0x197   :  { %2930 = vmatpush2.bf16.msra.mxu1 %v4017_v8  ;;  %2888 = vmatprep.subr.bf16.mxu0 %v4022_v9 }
 0x198   :  { %2931 = vmatprep.subr.bf16.mxu1 %v4025_v10 }
 0x19a   :  { %2889 = vmatpush2.bf16.msra.mxu0 %v4020_v11 }
 0x19b   :  { %2932 = vmatpush2.bf16.msra.mxu1 %v4023_v14  ;;  %2890 = vmatprep.subr.bf16.mxu0 %v4028_v15 }
 0x19c   :  { %2933 = vmatprep.subr.bf16.mxu1 %v4031_v16 }
 0x19e   :  { %2891 = vmatpush2.bf16.msra.mxu0 %v4026_v17 }
 0x19f   :  { %2934 = vmatpush2.bf16.msra.mxu1 %v4029_v18  ;;  %2892 = vmatprep.subr.bf16.mxu0 %v4034_v19 }
 0x1a0   :  { %2935 = vmatprep.subr.bf16.mxu1 %v4037_v20 }
 0x1a2   :  { %2893 = vmatpush2.bf16.msra.mxu0 %v4032_v22 }
 0x1a3   :  { %2936 = vmatpush2.bf16.msra.mxu1 %v4035_v23  ;;  %2894 = vmatprep.subr.bf16.mxu0 %v4040_v24 }
 0x1a4   :  { %2937 = vmatprep.subr.bf16.mxu1 %v4043_v25 }
 0x1a6   :  { %2895 = vmatpush2.bf16.msra.mxu0 %v4038_v28 }
 0x1a7   :  { %2938 = vmatpush2.bf16.msra.mxu1 %v4041_v29 }
 0x1a9   :  { %v2640_v34 = vpop.f32.mrf.mxu0  ;;  %2897 = vmatmul.mubr.bf16.vlgmr.msra.gmra.mxu0 %v4176_v12  ;;  %v480_v12 = vsub.s32 6, %v4192_v21 }
 0x1aa   :  { %v2683_v54 = vpop.f32.mrf.mxu1  ;;  %2940 = vmatmul.mubr.bf16.vlgmr.msra.gmra.mxu1 %v4178_v13  ;;  %v2641_v35 = vadd.f32 %v2640_v34, %v473_v33  ;;  %v484_v13 = vsub.s32 7, %v4192_v21 }
 0x1ab   :  { %v2642_v36 = vpop.f32.mrf.mxu0  ;;  %v481_v51 = vrot.slane %v4194_v26, %v480_v12 }
 0x1ac   :  { %v2685_v37 = vpop.f32.mrf.mxu1  ;;  %v2684_v38 = vadd.f32 %v2683_v54, %v2641_v35  ;;  %v2643_v39 = vadd.f32 %v2642_v36, %v477_v53  ;;  %v485_v52 = vrot.slane %v4194_v26, %v484_v13  ;;  %v451_v26 = vld [vmem:[#allocation7 + $0x8] sm:$0xf] }
 0x1ad   :  { %v2644_v40 = vpop.f32.mrf.mxu0  ;;  %v489_v11 = vrot.slane %v451_v26, %v456_v27  ;;  %v493_v14 = vrot.slane %v451_v26, %v460_v30  ;;  %v497_v30 = vrot.slane %v451_v26, %v464_v59  ;;  %v501_v54 = vrot.slane %v451_v26, %v468_v62 }
 0x1ae   :  { %v2687_v41 = vpop.f32.mrf.mxu1  ;;  %v2686_v42 = vadd.f32 %v2685_v37, %v2643_v39  ;;  %v2645_v43 = vadd.f32 %v2644_v40, %v473_v33 }
 0x1af   :  { %v2646_v44 = vpop.f32.mrf.mxu0 }
 0x1b0   :  { %v3450_v45 = vpack.c.bf16 %v2686_v42, %v2684_v38  ;;  %v2647_v46 = vadd.f32 %v2646_v44, %v477_v53  ;;  %v2689_v47 = vpop.f32.mrf.mxu1  ;;  %v2688_v48 = vadd.f32 %v2687_v41, %v2645_v43 }
 0x1b2   :  { %3024 = vst [vmem:[#allocation8 + $0x10] sm:$0xff] %v3450_v45  ;;  %v2690_v49 = vadd.f32 %v2689_v47, %v2647_v46 }
 0x1b4   :  { %v3456_v50 = vpack.c.bf16 %v2690_v49, %v2688_v48 }
 0x1b6   :  { %3030 = vst [vmem:[#allocation8 + $0x40] sm:$0xff] %v3456_v50 }
 0x1e9   :  { %v2726_v55 = vpop.f32.mrf.mxu0 }
 0x1ea   :  { %v2769_v56 = vpop.f32.mrf.mxu1  ;;  %v2727_v57 = vadd.f32 %v2726_v55, %v481_v51 }
 0x1eb   :  { %v2728_v58 = vpop.f32.mrf.mxu0 }
 0x1ec   :  { %v2771_v60 = vpop.f32.mrf.mxu1  ;;  %v2770_v61 = vadd.f32 %v2769_v56, %v2727_v57  ;;  %v2729_v63 = vadd.f32 %v2728_v58, %v485_v52 }
 0x1ed   :  { %v2730_v0 = vpop.f32.mrf.mxu0 }
 0x1ee   :  { %v2773_v1 = vpop.f32.mrf.mxu1  ;;  %v2772_v2 = vadd.f32 %v2771_v60, %v2729_v63  ;;  %v2731_v3 = vadd.f32 %v2730_v0, %v481_v51 }
 0x1ef   :  { %v2732_v4 = vpop.f32.mrf.mxu0 }
 0x1f0   :  { %v3451_v5 = vpack.c.bf16 %v2772_v2, %v2770_v61  ;;  %v2733_v6 = vadd.f32 %v2732_v4, %v485_v52  ;;  %v2775_v7 = vpop.f32.mrf.mxu1  ;;  %v2774_v8 = vadd.f32 %v2773_v1, %v2731_v3 }
 0x1f2   :  { %3025 = vst [vmem:[#allocation8 + $0x18] sm:$0xff] %v3451_v5  ;;  %v2776_v9 = vadd.f32 %v2775_v7, %v2733_v6 }
 0x1f4   :  { %v3457_v10 = vpack.c.bf16 %v2776_v9, %v2774_v8 }
 0x1f6   :  { %3031 = vst [vmem:[#allocation8 + $0x48] sm:$0xff] %v3457_v10 }
 0x229   :  { %v2812_v15 = vpop.f32.mrf.mxu0 }
 0x22a   :  { %v2855_v16 = vpop.f32.mrf.mxu1  ;;  %v2813_v17 = vadd.f32 %v2812_v15, %v489_v11 }
 0x22b   :  { %v2814_v18 = vpop.f32.mrf.mxu0 }
 0x22c   :  { %v2857_v19 = vpop.f32.mrf.mxu1  ;;  %v2856_v20 = vadd.f32 %v2855_v16, %v2813_v17  ;;  %v2815_v22 = vadd.f32 %v2814_v18, %v493_v14 }
 0x22d   :  { %v2816_v23 = vpop.f32.mrf.mxu0 }
 0x22e   :  { %v2859_v24 = vpop.f32.mrf.mxu1  ;;  %v2858_v25 = vadd.f32 %v2857_v19, %v2815_v22  ;;  %v2817_v28 = vadd.f32 %v2816_v23, %v489_v11 }
 0x22f   :  { %v2818_v29 = vpop.f32.mrf.mxu0 }
 0x230   :  { %v3452_v31 = vpack.c.bf16 %v2858_v25, %v2856_v20  ;;  %v2819_v32 = vadd.f32 %v2818_v29, %v493_v14  ;;  %v2861_v33 = vpop.f32.mrf.mxu1  ;;  %v2860_v27 = vadd.f32 %v2859_v24, %v2817_v28 }
 0x232   :  { %3026 = vst [vmem:[#allocation8 + $0x20] sm:$0xff] %v3452_v31  ;;  %v2862_v53 = vadd.f32 %v2861_v33, %v2819_v32 }
 0x234   :  { %v3458_v34 = vpack.c.bf16 %v2862_v53, %v2860_v27 }
 0x236   :  { %3032 = vst [vmem:[#allocation8 + $0x50] sm:$0xff] %v3458_v34 }
 0x269   :  { %v2898_v35 = vpop.f32.mrf.mxu0 }
 0x26a   :  { %v2941_v36 = vpop.f32.mrf.mxu1  ;;  %v2899_v37 = vadd.f32 %v2898_v35, %v497_v30 }
 0x26b   :  { %v2900_v38 = vpop.f32.mrf.mxu0 }
 0x26c   :  { %v2943_v39 = vpop.f32.mrf.mxu1  ;;  %v2901_v40 = vadd.f32 %v2900_v38, %v501_v54  ;;  %v2942_v43 = vadd.f32 %v2941_v36, %v2899_v37 }
 0x26d   :  { %v2902_v41 = vpop.f32.mrf.mxu0 }
 0x26e   :  { %v2945_v42 = vpop.f32.mrf.mxu1  ;;  %v2944_v44 = vadd.f32 %v2943_v39, %v2901_v40  ;;  %v2903_v45 = vadd.f32 %v2902_v41, %v497_v30 }
 0x26f   :  { %v2904_v46 = vpop.f32.mrf.mxu0 }
 0x270   :  { %v3453_v47 = vpack.c.bf16 %v2944_v44, %v2942_v43  ;;  %v2905_v48 = vadd.f32 %v2904_v46, %v501_v54  ;;  %v2947_v49 = vpop.f32.mrf.mxu1  ;;  %v2946_v21 = vadd.f32 %v2945_v42, %v2903_v45 }
 0x272   :  { %3027 = vst [vmem:[#allocation8 + $0x28] sm:$0xff] %v3453_v47  ;;  %v2948_v59 = vadd.f32 %v2947_v49, %v2905_v48 }
 0x274   :  { %v3459_v62 = vpack.c.bf16 %v2948_v59, %v2946_v21 }
 0x276   :  { %3033 = vst [vmem:[#allocation8 + $0x58] sm:$0xff] %v3459_v62 }
 0x277   :  { %4115 = shalt.err (!%p4112_p5)
}
 0x278   :  { %3045 = dma.vmem_to_hbm [thread:$0]  %s3040_s2, 1536, %s4247_s3, [#allocation4], %s4131_s15, %s4131_s15, %s4132_s16  }
 0x279   :  { %4128 = dma.done.wait [#allocation4], 1536  }
 0x27a   :  { %4129 = vsyncadd [#allocation4], 4294965760 }
 0x27b   :  { %3049 = vsyncpa [#allocation3], 1 }
 0x27c   :  { %3050 = vsyncpa [#allocation6], 1 }
 0x27d   :  { %3051 = vsyncpa [#allocation4], 1 }

</bundles_post_ra>
